<compile_context>
chip_gen: v6e
topology: v6e:2x2x1
jax: 0.10.0
libtpu: 0.0.40
codegen_flags: <defaults>
</compile_context>

<pallas_src>
import jax
import jax.numpy as jnp
from jax.experimental import pallas as pl
from jax.experimental.pallas import tpu as pltpu


# --------------------------------------------------------------------------
# Kernel
# --------------------------------------------------------------------------
def _attention_kernel(x_ref, z_ref, a_ref, w1t_ref, b1_ref, w2_ref, b2t_ref,
                      o_ref, kT_ref):
    """One (batch, query-row-tile) step of the fused attention forward.

    x_ref   : (1, TQ, Fin)  bf16   query-row tile of X
    z_ref   : (1, N,  Fin)  bf16   full Z for this batch (resident across tiles)
    a_ref   : (1, TQ, N)    f32    adjacency / mask tile
    w1t_ref : (Fin, Fout)   bf16   W1^T, pre-scaled by 1/sqrt(Fout)
    b1_ref  : (1, Fout)     f32    b1,   pre-scaled by 1/sqrt(Fout)
    w2_ref  : (Fout, Fin)   bf16   W2
    b2t_ref : (Fout, 1)     f32    b2 as a column
    o_ref   : (1, TQ, N)    f32    softmax(Q K / sqrt(Fout)) * A  (row tile)
    kT_ref  : VMEM (Fout, N) bf16  per-batch K^T cache (scratch)
    """
    # ---- K^T cache: computed once per batch (row-tile index == 0) ----------
    @pl.when(pl.program_id(1) == 0)
    def _():
        # K^T[o, j] = sum_c W2[o, c] * Z[b, j, c] + b2[o]
        kt = jax.lax.dot_general(
            w2_ref[...], z_ref[0],
            (((1,), (1,)), ((), ())),
            preferred_element_type=jnp.float32) + b2t_ref[...]
        kT_ref[...] = kt.astype(jnp.bfloat16)

    # ---- Q projection for this row tile (scale already folded into W1/b1) --
    q = (jnp.dot(x_ref[0], w1t_ref[...], preferred_element_type=jnp.float32)
         + b1_ref[...])                                        # (TQ, Fout) f32

    # ---- scores = Q_scaled @ K^T : plain NN matmul against the cached K^T --
    s = jnp.dot(q.astype(jnp.bfloat16), kT_ref[...],
                preferred_element_type=jnp.float32)            # (TQ, N) f32

    # ---- row softmax (max-subtracted); reciprocal runs on the EUP ----------
    s = s - jnp.max(s, axis=-1, keepdims=True)
    e = jnp.exp(s)
    inv = pl.reciprocal(jnp.sum(e, axis=-1, keepdims=True), approx=True)
    o_ref[0] = ((e * inv) * a_ref[0]).astype(o_ref.dtype)


# --------------------------------------------------------------------------
# Parameter prep + wrapper
# --------------------------------------------------------------------------
def prepare_attention_params(w1, b1, w2, b2):
    """Done once at init: fold the 1/sqrt(out_channels) attention scale into
    the Q projection, pre-transpose W1, and pre-cast the MXU operands to bf16."""
    fout = w1.shape[0]
    s = jnp.float32(1.0) / jnp.sqrt(jnp.float32(fout))
    return {
        "w1t": (w1.T * s).astype(jnp.bfloat16),                  # (Fin, Fout)
        "b1": (b1 * s).reshape(1, fout).astype(jnp.float32),     # (1, Fout)
        "w2": w2.astype(jnp.bfloat16),                           # (Fout, Fin)
        "b2t": b2.reshape(fout, 1).astype(jnp.float32),          # (Fout, 1)
        "fout": fout,
    }


def attention(X, A, Z, params, *, tq=None):
    """X, Z: (B, N, Fin) f32; A: (B, N, N) f32  ->  (B, N, N) f32."""
    B, N, Fin = X.shape
    fout = params["fout"]

    if tq is None:  # biggest aligned row tile that divides N (>=512 rows ideal)
        tq = next((t for t in (512, 256, 128) if N % t == 0), N)
    assert N % tq == 0, "query-row tile must divide N"

    # bf16 operands for the MXU (also halves X/Z HBM + VMEM bytes).
    Xb = X.astype(jnp.bfloat16)
    Zb = Z.astype(jnp.bfloat16)

    # Explicit VMEM budget: double-buffered tiles + K^T scratch + weights.
    f32, bf16 = 4, 2
    tile_bytes = (
        2 * (tq * Fin * bf16)                         # X row tile
        + 2 * (N * Fin * bf16)                        # Z (per-batch block)
        + 2 * (tq * N * f32)                          # A row tile
        + 2 * (tq * N * f32)                          # output row tile
        + fout * N * bf16                             # K^T scratch
        + 2 * (Fin * fout * bf16 + fout * f32
               + fout * Fin * bf16 + fout * f32)      # weights / biases
    )
    vmem_limit = int(min(64 * 1024 * 1024, max(8 * 1024 * 1024, 2 * tile_bytes)))

    return pl.pallas_call(
        _attention_kernel,
        out_shape=jax.ShapeDtypeStruct((B, N, N), jnp.float32),
        grid=(B, N // tq),
        in_specs=[
            pl.BlockSpec((1, tq, Fin), lambda b, qi: (b, qi, 0)),   # X row tile
            pl.BlockSpec((1, N, Fin), lambda b, qi: (b, 0, 0)),     # Z (full)
            pl.BlockSpec((1, tq, N), lambda b, qi: (b, qi, 0)),     # A row tile
            pl.BlockSpec((Fin, fout), lambda b, qi: (0, 0)),        # W1^T (scaled)
            pl.BlockSpec((1, fout), lambda b, qi: (0, 0)),          # b1 (scaled)
            pl.BlockSpec((fout, Fin), lambda b, qi: (0, 0)),        # W2
            pl.BlockSpec((fout, 1), lambda b, qi: (0, 0)),          # b2 column
        ],
        out_specs=pl.BlockSpec((1, tq, N), lambda b, qi: (b, qi, 0)),
        scratch_shapes=[pltpu.VMEM((fout, N), jnp.bfloat16)],       # K^T cache
        compiler_params=pltpu.CompilerParams(
            # batch axis: megacore-parallel (v7x); row-tile axis carries the
            # per-batch K^T cache -> "arbitrary".
            dimension_semantics=("parallel", "arbitrary"),
            vmem_limit_bytes=vmem_limit),
    )(Xb, Zb, A, params["w1t"], params["b1"], params["w2"], params["b2t"])


# --------------------------------------------------------------------------
if __name__ == "__main__":
    # Small, TPU-friendly shapes: everything (8,128)-aligned; tq=128 with N=256
    # exercises both grid axes (per-batch K^T caching across row tiles).
    B, N, Fin, Fout = 2, 256, 128, 128

    key = jax.random.PRNGKey(0)
    kx, ka, kz, kw1, kb1, kw2, kb2 = jax.random.split(key, 7)

    X = jax.random.normal(kx, (B, N, Fin), jnp.float32)
    A = jax.random.normal(ka, (B, N, N), jnp.float32)
    Z = jax.random.normal(kz, (B, N, Fin), jnp.float32)

    lim = (6.0 / (Fin + Fout)) ** 0.5
    w1 = jax.random.uniform(kw1, (Fout, Fin), jnp.float32, -lim, lim)
    b1 = jax.random.uniform(kb1, (Fout,), jnp.float32, -lim, lim)
    w2 = jax.random.uniform(kw2, (Fout, Fin), jnp.float32, -lim, lim)
    b2 = jax.random.uniform(kb2, (Fout,), jnp.float32, -lim, lim)

    params = prepare_attention_params(w1, b1, w2, b2)
    out = attention(X, A, Z, params, tq=128)
    jax.block_until_ready(out)

    # Pure-JAX reference with the exact PyTorch semantics of Attention.forward.
    Q = jnp.einsum("bnc,oc->bno", X, w1, precision="highest") + b1
    Kf = jnp.einsum("bnc,oc->bno", Z, w2, precision="highest") + b2
    scores = jnp.einsum("bno,bmo->bnm", Q, Kf, precision="highest") / (Fout ** 0.5)
    ref = jax.nn.softmax(scores, axis=-1) * A

    assert out.shape == (B, N, N)
    assert bool(jnp.all(jnp.isfinite(out)))
    max_err = float(jnp.max(jnp.abs(out - ref)))
    mean_err = float(jnp.mean(jnp.abs(out - ref)))
    # Slack covers bf16 MXU operands + the EUP approximate reciprocal vs. the
    # HIGHEST-precision f32 reference.
    assert max_err < 5e-2, f"max abs err {max_err}"
    assert mean_err < 5e-3, f"mean abs err {mean_err}"
    print("KERNEL_OK")
</pallas_src>

<mosaic_0001>
module attributes {stable_mosaic.version = 11 : i64} {
  func.func @_attention_kernel(%arg0: i32, %arg1: i32, %arg2: memref<1x128x128xbf16, #tpu.memory_space<vmem>>, %arg3: memref<1x256x128xbf16, #tpu.memory_space<vmem>>, %arg4: memref<1x128x256xf32, #tpu.memory_space<vmem>>, %arg5: memref<128x128xbf16, #tpu.memory_space<vmem>>, %arg6: memref<1x128xf32, #tpu.memory_space<vmem>>, %arg7: memref<128x128xbf16, #tpu.memory_space<vmem>>, %arg8: memref<128x1xf32, #tpu.memory_space<vmem>>, %arg9: memref<1x128x256xf32, #tpu.memory_space<vmem>>, %arg10: memref<128x256xbf16, #tpu.memory_space<vmem>>) attributes {dimension_semantics = [#tpu.dimension_semantics<parallel>, #tpu.dimension_semantics<arbitrary>], iteration_bounds = array<i64: 2, 2>, scalar_prefetch = 0 : i64, scratch_operands = 1 : i64, tpu.core_type = #tpu.core_type<tc>, window_params = [{transform_indices = @transform_0, window_bounds = array<i64: 1, 128, 128>}, {transform_indices = @transform_1, window_bounds = array<i64: 1, 256, 128>}, {transform_indices = @transform_2, window_bounds = array<i64: 1, 128, 256>}, {pipeline_mode = #tpu.pipeline_mode<synchronous>, transform_indices = @transform_3, window_bounds = array<i64: 128, 128>}, {pipeline_mode = #tpu.pipeline_mode<synchronous>, transform_indices = @transform_4, window_bounds = array<i64: 1, 128>}, {pipeline_mode = #tpu.pipeline_mode<synchronous>, transform_indices = @transform_5, window_bounds = array<i64: 128, 128>}, {pipeline_mode = #tpu.pipeline_mode<synchronous>, transform_indices = @transform_6, window_bounds = array<i64: 128, 1>}, {transform_indices = @transform_7, window_bounds = array<i64: 1, 128, 256>}]} {
    %c0_i32 = arith.constant 0 : i32
    %0 = arith.cmpi eq, %arg1, %c0_i32 : i32
    %1 = arith.extui %0 : i1 to i32
    %c0_i32_0 = arith.constant 0 : i32
    %2 = arith.cmpi ne, %1, %c0_i32_0 : i32
    scf.if %2 {
      %c0_18 = arith.constant 0 : index
      %c0_19 = arith.constant 0 : index
      %29 = vector.load %arg7[%c0_18, %c0_19] : memref<128x128xbf16, #tpu.memory_space<vmem>>, vector<128x128xbf16>
      %c0_20 = arith.constant 0 : index
      %c0_21 = arith.constant 0 : index
      %c0_22 = arith.constant 0 : index
      %30 = vector.load %arg3[%c0_20, %c0_21, %c0_22] : memref<1x256x128xbf16, #tpu.memory_space<vmem>>, vector<1x256x128xbf16>
      %31 = vector.shape_cast %30 : vector<1x256x128xbf16> to vector<256x128xbf16>
      %cst_23 = arith.constant dense<0.000000e+00> : vector<128x256xf32>
      %32 = tpu.matmul %29, %31, %cst_23 {dimension_numbers = #tpu.dot_dimension_numbers<[1], [1], [0], [0], [0, 0, 1, 0], [], []>} : vector<128x128xbf16>, vector<256x128xbf16>, vector<128x256xf32> -> vector<128x256xf32>
      %c0_24 = arith.constant 0 : index
      %c0_25 = arith.constant 0 : index
      %33 = vector.load %arg8[%c0_24, %c0_25] : memref<128x1xf32, #tpu.memory_space<vmem>>, vector<128x1xf32>
      %34 = vector.broadcast %33 : vector<128x1xf32> to vector<128x256xf32>
      %35 = arith.addf %32, %34 : vector<128x256xf32>
      %36 = arith.truncf %35 : vector<128x256xf32> to vector<128x256xbf16>
      %c0_26 = arith.constant 0 : index
      %c0_27 = arith.constant 0 : index
      %37 = vector.load %arg10[%c0_26, %c0_27] : memref<128x256xbf16, #tpu.memory_space<vmem>>, vector<128x256xbf16>
      tpu.vector_store %arg10[%c0_26, %c0_27], %36 {strides = array<i32>} : memref<128x256xbf16, #tpu.memory_space<vmem>>, vector<128x256xbf16>,
    } else {
    }
    %c0 = arith.constant 0 : index
    %c0_1 = arith.constant 0 : index
    %c0_2 = arith.constant 0 : index
    %3 = vector.load %arg2[%c0, %c0_1, %c0_2] : memref<1x128x128xbf16, #tpu.memory_space<vmem>>, vector<1x128x128xbf16>
    %4 = vector.shape_cast %3 : vector<1x128x128xbf16> to vector<128x128xbf16>
    %c0_3 = arith.constant 0 : index
    %c0_4 = arith.constant 0 : index
    %5 = vector.load %arg5[%c0_3, %c0_4] : memref<128x128xbf16, #tpu.memory_space<vmem>>, vector<128x128xbf16>
    %cst = arith.constant dense<0.000000e+00> : vector<128x128xf32>
    %6 = tpu.matmul %4, %5, %cst {dimension_numbers = #tpu.dot_dimension_numbers<[1], [0], [0], [1], [0, 0, 1, 1], [], []>} : vector<128x128xbf16>, vector<128x128xbf16>, vector<128x128xf32> -> vector<128x128xf32>
    %c0_5 = arith.constant 0 : index
    %c0_6 = arith.constant 0 : index
    %7 = vector.load %arg6[%c0_5, %c0_6] : memref<1x128xf32, #tpu.memory_space<vmem>>, vector<1x128xf32>
    %8 = vector.broadcast %7 : vector<1x128xf32> to vector<128x128xf32>
    %9 = arith.addf %6, %8 : vector<128x128xf32>
    %10 = arith.truncf %9 : vector<128x128xf32> to vector<128x128xbf16>
    %c0_7 = arith.constant 0 : index
    %c0_8 = arith.constant 0 : index
    %11 = vector.load %arg10[%c0_7, %c0_8] : memref<128x256xbf16, #tpu.memory_space<vmem>>, vector<128x256xbf16>
    %cst_9 = arith.constant dense<0.000000e+00> : vector<128x256xf32>
    %12 = tpu.matmul %10, %11, %cst_9 {dimension_numbers = #tpu.dot_dimension_numbers<[1], [0], [0], [1], [0, 0, 1, 1], [], []>} : vector<128x128xbf16>, vector<128x256xbf16>, vector<128x256xf32> -> vector<128x256xf32>
    %cst_10 = arith.constant dense<0xFF800000> : vector<128xf32>
    %13 = vector.multi_reduction <maximumf>, %12, %cst_10 [1] : vector<128x256xf32> to vector<128xf32>
    %14 = vector.shape_cast %13 : vector<128xf32> to vector<128x1xf32>
    %15 = vector.broadcast %14 : vector<128x1xf32> to vector<128x256xf32>
    %16 = arith.subf %12, %15 : vector<128x256xf32>
    %17 = math.exp %16 : vector<128x256xf32>
    %cst_11 = arith.constant dense<0.000000e+00> : vector<128xf32>
    %18 = vector.multi_reduction <add>, %17, %cst_11 [1] : vector<128x256xf32> to vector<128xf32>
    %19 = vector.shape_cast %18 : vector<128xf32> to vector<128x1xf32>
    %20 = tpu.reciprocal %19 {approx = true} : vector<128x1xf32> -> vector<128x1xf32>
    %21 = vector.broadcast %20 : vector<128x1xf32> to vector<128x256xf32>
    %22 = arith.mulf %17, %21 : vector<128x256xf32>
    %c0_12 = arith.constant 0 : index
    %c0_13 = arith.constant 0 : index
    %c0_14 = arith.constant 0 : index
    %23 = vector.load %arg4[%c0_12, %c0_13, %c0_14] : memref<1x128x256xf32, #tpu.memory_space<vmem>>, vector<1x128x256xf32>
    %24 = vector.shape_cast %23 : vector<1x128x256xf32> to vector<128x256xf32>
    %25 = arith.mulf %22, %24 : vector<128x256xf32>
    %c0_15 = arith.constant 0 : index
    %c0_16 = arith.constant 0 : index
    %c0_17 = arith.constant 0 : index
    %26 = vector.load %arg9[%c0_15, %c0_16, %c0_17] : memref<1x128x256xf32, #tpu.memory_space<vmem>>, vector<1x128x256xf32>
    %27 = vector.shape_cast %26 : vector<1x128x256xf32> to vector<128x256xf32>
    %28 = vector.shape_cast %25 : vector<128x256xf32> to vector<1x128x256xf32>
    tpu.vector_store %arg9[%c0_15, %c0_16, %c0_17], %28 {strides = array<i32>} : memref<1x128x256xf32, #tpu.memory_space<vmem>>, vector<1x128x256xf32>,
    return
  }
  func.func @transform_0(%arg0: i32, %arg1: i32) -> (i32, i32, i32) {
    %c0_i32 = arith.constant 0 : i32
    %c0_i32_0 = arith.constant 0 : i32
    return %arg0, %arg1, %c0_i32 : i32, i32, i32
  }
  func.func @transform_1(%arg0: i32, %arg1: i32) -> (i32, i32, i32) {
    %c0_i32 = arith.constant 0 : i32
    %c0_i32_0 = arith.constant 0 : i32
    %c0_i32_1 = arith.constant 0 : i32
    return %arg0, %c0_i32, %c0_i32_0 : i32, i32, i32
  }
  func.func @transform_2(%arg0: i32, %arg1: i32) -> (i32, i32, i32) {
    %c0_i32 = arith.constant 0 : i32
    %c0_i32_0 = arith.constant 0 : i32
    return %arg0, %arg1, %c0_i32 : i32, i32, i32
  }
  func.func @transform_3(%arg0: i32, %arg1: i32) -> (i32, i32) {
    %c0_i32 = arith.constant 0 : i32
    %c0_i32_0 = arith.constant 0 : i32
    %c0_i32_1 = arith.constant 0 : i32
    return %c0_i32, %c0_i32_0 : i32, i32
  }
  func.func @transform_4(%arg0: i32, %arg1: i32) -> (i32, i32) {
    %c0_i32 = arith.constant 0 : i32
    %c0_i32_0 = arith.constant 0 : i32
    %c0_i32_1 = arith.constant 0 : i32
    return %c0_i32, %c0_i32_0 : i32, i32
  }
  func.func @transform_5(%arg0: i32, %arg1: i32) -> (i32, i32) {
    %c0_i32 = arith.constant 0 : i32
    %c0_i32_0 = arith.constant 0 : i32
    %c0_i32_1 = arith.constant 0 : i32
    return %c0_i32, %c0_i32_0 : i32, i32
  }
  func.func @transform_6(%arg0: i32, %arg1: i32) -> (i32, i32) {
    %c0_i32 = arith.constant 0 : i32
    %c0_i32_0 = arith.constant 0 : i32
    %c0_i32_1 = arith.constant 0 : i32
    return %c0_i32, %c0_i32_0 : i32, i32
  }
  func.func @transform_7(%arg0: i32, %arg1: i32) -> (i32, i32, i32) {
    %c0_i32 = arith.constant 0 : i32
    %c0_i32_0 = arith.constant 0 : i32
    return %arg0, %arg1, %c0_i32 : i32, i32, i32
  }
}

</mosaic_0001>

<bundles_post_ra>
// kernel: tpu_custom_call.1
= control target key start
LH: loop header
LB: loop body
LE: loop exit
PB: predicated region body
PF: predicated region fallthrough
CT: control target
= control target key end

     0   :  { %s3385_s0 = inlined_call_operand.hbm [shape: bf16[2,256,128], index: 0, kind: input, shape index: {}]   ;;  %s3386_s1 = inlined_call_operand.hbm [shape: bf16[2,256,128], index: 1, kind: input, shape index: {}]   ;;  %s3387_s2 = inlined_call_operand.hbm [shape: f32[2,256,256], index: 2, kind: input, shape index: {}]   ;;  %s3388_s3 = inlined_call_operand.vmem [shape: bf16[128,128], index: 3, kind: input, shape index: {}]   ;;  %s3389_s4 = inlined_call_operand.vmem [shape: f32[1,128], index: 4, kind: input, shape index: {}]   ;;  %s3390_s5 = inlined_call_operand.vmem [shape: bf16[128,128], index: 5, kind: input, shape index: {}]   ;;  %s3391_s6 = inlined_call_operand.vmem [shape: f32[128,1], index: 6, kind: input, shape index: {}]   ;;  %s3392_s7 = inlined_call_operand.hbm [shape: f32[2,256,256], index: 7, kind: output, shape index: {}]  }
   0x1   :  { %3408 = sst [smem:[#allocation24_spill]] %s3385_s0 }
   0x2   :  { %3409 = sst [smem:[#allocation25_spill]] %s3386_s1 }
   0x3   :  { %3410 = sst [smem:[#allocation26_spill]] %s3388_s3 }
   0x4   :  { %3411 = sst [smem:[#allocation27_spill]] %s3389_s4 }
   0x5   :  { %3412 = sst [smem:[#allocation28_spill]] %s3390_s5 }
   0x6   :  { %3413 = sst [smem:[#allocation29_spill]] %s3391_s6 }
   0x7   :  { %3414 = sst [smem:[#allocation30_spill]] %s3392_s7 }
   0x8   :  { %12 = vsyncpa [#allocation4], 0 }
   0x9   :  { %14 = vsyncpa [#allocation4 + $0x1], 0 }
   0xa   :  { %15 = vsyncpa [#allocation7], 0 }
   0xb   :  { %17 = vsyncpa [#allocation7 + $0x1], 0 }
   0xc   :  { %18 = vsyncpa [#allocation5], 0 }
   0xd   :  { %20 = vsyncpa [#allocation5 + $0x1], 0  ;;  %s2628_s24 = smov 0   ;;  %s2630_s25 = smov 0  }
   0xe   :  { %s2632_s26 = smov 0   ;;  %s2634_s27 = smov 0  }
   0xf   :  { %s2636_s28 = smov 0   ;;  %s2638_s29 = smov 0  }
  0x10   :  { %s2640_s30 = smov 0   ;;  %s2642_s8 = smov 0  }
  0x11   :  { %s2644_s9 = smov 0   ;;  %s2646_s10 = smov 0  }
  0x12   :  { %s2648_s11 = smov 0  }
  0x13 LB: > { %3415 = sst [smem:[#allocation14_spill]] %s2542_s26  ;;  %s2682_s12 = sadd.s32 4294967295, %s2574_s11   ;;  %s2574_s11 = sphi %s2648_s11, %s26_s11   ;;  %s2570_s10 = sphi %s2646_s10, %s3461_s10   ;;  %s2566_s9 = sphi %s2644_s9, %s3460_s9   ;;  %s2562_s8 = sphi %s2642_s8, %s3459_s8   ;;  %s2558_s30 = sphi %s2640_s30, %s3458_s30   ;;  %s2554_s29 = sphi %s2638_s29, %s3451_s29   ;;  %s2550_s28 = sphi %s2636_s28, %s3457_s28   ;;  %s2546_s27 = sphi %s2634_s27, %s3456_s27   ;;  %s2542_s26 = sphi %s2632_s26, %s3449_s26   ;;  %s2538_s25 = sphi %s2630_s25, %s3455_s25   ;;  %s2534_s24 = sphi %s2628_s24, %s3454_s24  }
  0x14   : > { %3416 = sst [smem:[#allocation15_spill]] %s2546_s27  ;;  %p55_p0 = scmp.eq.s32.totalorder %s2574_s11, 0 }
  0x15   : > { %3417 = sst [smem:[#allocation16_spill]] %s2554_s29  ;;  %p61_p1 = scmp.eq.s32.totalorder %s2682_s12, 0 }
  0x16   : > { %3418 = sst [smem:[#allocation17_spill]] %s2562_s8  ;;  %p80_p2 = scmp.ne.s32.totalorder %s2542_s26, %s2538_s25 }
  0x17   : > { %p86_p3 = scmp.ne.s32.totalorder %s2538_s25, %s2534_s24  ;;  %p3393_p4 = scmp.lt.s32.totalorder %s2574_s11, 4 }
  0x18   : > { %p82_p5 = por %p80_p2, %p55_p0  ;;  %s285_s15 = sand.u32 1, %s2574_s11  }
  0x19   : > { %p2695_p6 = por %p86_p3, %p61_p1  ;;  %s287_s16 = sand.u32 1, %s2542_s26  }
  0x1a   : > { %s1864_s17 = sshll.u32 %s287_s16, 7  ;;  %s1958_s18 = sshll.u32 %s2570_s10, 11 }
  0x1b   : > { %s3420_s1 = sld [smem:[#allocation25_spill]]  ;;  %s289_s22 = scalar_lea.vmem [#allocation6], %s1864_s17 }
  0x1c   : > { %s296_s23 = sshll.u32 %s289_s22, 4  ;;  %p2707_p7 = pnand %p3393_p4, %p82_p5  ;;  %s297_s23 = int_to_ptr.vmem [resolvable:$true] %s296_s23 }
  0x1d   : > { %p1872_p8 = scmp.ge.s32.totalorder %s2574_s11, 1  ;;  %p328_p9 = scmp.lt.s32.totalorder %s2574_s11, 5 }
  0x1e   : > { %s2713_s13 = scalar_lea.sflag [#allocation7], %s285_s15  ;;  %p2364_p10 = pneg %p2707_p7 }
  0x1f   : > { %s2375_s16 = scalar_lea.vmem %s297_s23, 2048 }
  0x20   : > { %p2376_p11 = scmp.ne.s32.totalorder %s297_s23, %s2375_s16 }
  0x21   : > { %s295_s21 = scalar_lea.hbm %s3420_s1, %s1958_s18  ;;  %s2576_s18 = smov [#allocation6]  }
  0x22   : > { %p2378_p12 = pnand %p2376_p11, %p2364_p10  ;;  %s2380_s17 = sshll.u32 %s2576_s18, 4  ;;  %s2381_s17 = int_to_ptr.vmem [resolvable:$false] %s2380_s17 }
  0x23   : > { %s2382_s19 = scalar_lea.vmem %s2381_s17, 4096  ;;  %p2383_p2 = scmp.lt.s32.totalorder %s297_s23, %s2381_s17 }
  0x24   : > { %p2379_p13 = pneg %p2378_p12  ;;  %p2384_p3 = scmp.lt.s32.totalorder %s2382_s19, %s2375_s16 }
  0x26   : > { %p2385_p5 = por %p2384_p3, %p2383_p2 }
  0x28   : > { %p2386_p4 = pnand %p2385_p5, %p2379_p13 }
  0x2a   : > { %2389 = shalt.err (!%p2386_p4)
}
  0x2b   : > { %s3394_s20 = smov 64   ;;  %s3395_s15 = smov 4  }
  0x2c   : > { %2103 = dma.hbm_to_vmem [thread:$0]  (!%p2707_p7), %s295_s21, 2048, %s297_s23, %s2713_s13, %s3394_s20, %s3394_s20, %s3395_s15  }
  0x2d   : > { %p2727_p4 = pnand %p1872_p8, %p328_p9  ;;  %s1857_s16 = sadd.s32 4294967294, %s2574_s11  }
  0x2e   : > { %s35_s18 = sadd.s32 1, %s2566_s9  ;;  %s38_s17 = sadd.s32 1, %s2570_s10 }
  0x2f   : > { %p36_p10 = scmp.ge.s32.totalorder %s35_s18, 2  ;;  %s47_s19 = sadd.s32 1, %s2554_s29 }
  0x30   : > { %p54_p11 = scmp.ne.s32.totalorder %s2554_s29, %s2550_s28  ;;  %p60_p9 = scmp.ne.s32.totalorder %s2550_s28, %s2546_s27 }
  0x31   : > { %s3463_s18 = smov (%p36_p10, %s35_s18), 0  ;;  %s3465_s17 = smov (!%p36_p10, %s38_s17), %s2570_s10 }
  0x32   : > { %3423 = sst [smem:[#allocation18_spill]] %s3463_s18  ;;  %s43_s21 = ssub.s32 %s2566_s9, %s3463_s18 }
  0x33   : > { %p2744_p7 = por %p55_p0, %p54_p11  ;;  %p40_p8 = scmp.ge.s32.totalorder %s3465_s17, 2 }
  0x34   : > { %p224_p12 = scmp.eq.s32.totalorder %s2682_s12, 3  ;;  %p230_p13 = scmp.eq.s32.totalorder %s1857_s16, 3 }
  0x35   : > { %s3467_s17 = smov (%p40_p8, %s3465_s17), 0  ;;  %p2755_p2 = por %p61_p1, %p60_p9 }
  0x36   : > { %3425 = sst [smem:[#allocation19_spill]] %s3467_s17  ;;  %p2759_p3 = por %p224_p12, %p54_p11 }
  0x37   : > { %s42_s15 = ssub.s32 %s2570_s10, %s3467_s17  ;;  %p2765_p0 = por %p230_p13, %p60_p9 }
  0x38   : > { %s3427_s20 = scalar_select %p2759_p3, 1, 0 }
  0x39   : > { %s3429_s1 = scalar_select %p2765_p0, 1, 0 }
  0x3a   : > { %3428 = sst [smem:[#allocation20_spill]] %s3427_s20  ;;  %s44_s16 = sor.u32 %s43_s21, %s42_s15 }
  0x3b   : > { %3430 = sst [smem:[#allocation21_spill]] %s3429_s1  ;;  %p71_p5 = scmp.eq.s32.totalorder %s42_s15, 0 }
  0x3c   : > { %p45_p10 = scmp.eq.s32.totalorder %s44_s16, 0  ;;  %s2770_s18 = sand.u32 1, %s2554_s29  }
  0x3d   : > { %s3431_s27 = sadd.s32 1, %s2542_s26  ;;  %s1860_s17 = sshll.u32 %s2770_s18, 6 }
  0x3e   : > { %s2775_s7 = scalar_select %p71_p5, %s2542_s26, %s3431_s27  }
  0x3f   : > { %s2778_s8 = scalar_select %p45_p10, %s2554_s29, %s47_s19  }
  0x40   : > { %3432 = sst [smem:[#allocation22_spill]] %s2775_s7  ;;  %s1861_s20 = sshll.u32 %s2566_s9, 4 }
  0x41   : > { %3433 = sst [smem:[#allocation23_spill]] %s2778_s8  ;;  %s1862_s4 = sshll.u32 %s2570_s10, 5 }
  0x42   : > { %s266_s3 = scalar_lea.vmem [#allocation3], %s1860_s17  ;;  %s272_s5 = sadd.s32 %s1862_s4, %s1861_s20 }
  0x43   : > { %s275_s6 = sshll.u32 %s266_s3, 4  ;;  %s1863_s21 = sshll.u32 %s272_s5, 6  ;;  %s276_s6 = int_to_ptr.vmem [resolvable:$true] %s275_s6 }
  0x44   : > { %p3434_p1 = scmp.lt.s32.totalorder %s2574_s11, 4  ;;  %s3436_s0 = sld [smem:[#allocation24_spill]] }
  0x45   : > { %s1867_s19 = sshll.u32 %s2770_s18, 8  ;;  %s263_s8 = scalar_lea.sflag [#allocation4], %s2770_s18 }
  0x46   : > { %p2787_p11 = pnand %p3434_p1, %p2744_p7  ;;  %s2403_s3 = scalar_lea.vmem %s276_s6, 1024 }
  0x47   : > { %p2404_p9 = scmp.ne.s32.totalorder %s276_s6, %s2403_s3  ;;  %s2579_s4 = smov [#allocation3]  }
  0x48   : > { %p2392_p8 = pneg %p2787_p11  ;;  %s2408_s5 = sshll.u32 %s2579_s4, 4  ;;  %s2409_s5 = int_to_ptr.vmem [resolvable:$false] %s2408_s5 }
  0x49   : > { %s2410_s20 = scalar_lea.vmem %s2409_s5, 2048  ;;  %p2411_p7 = scmp.lt.s32.totalorder %s276_s6, %s2409_s5 }
  0x4a   : > { %s274_s27 = scalar_lea.hbm %s3436_s0, %s1863_s21  ;;  %p2406_p12 = pnand %p2404_p9, %p2392_p8 }
  0x4b   : > { %p2412_p5 = scmp.lt.s32.totalorder %s2410_s20, %s2403_s3 }
  0x4c   : > { %p2407_p13 = pneg %p2406_p12 }
  0x4d   : > { %p2413_p10 = por %p2412_p5, %p2411_p7 }
  0x4f   : > { %p2414_p1 = pnand %p2413_p10, %p2407_p13 }
  0x51   : > { %2417 = shalt.err (!%p2414_p1)
}
  0x52   : > { %s3437_s1 = smov 4   ;;  %s3438_s18 = smov 64  }
  0x53   : > { %2100 = dma.hbm_to_vmem [thread:$0]  (!%p2787_p11), %s274_s27, 1024, %s276_s6, %s263_s8, %s3438_s18, %s3438_s18, %s3437_s1  }
  0x54   : > { %s1959_s17 = sshll.u32 %s2566_s9, 5  ;;  %s1870_s23 = sshll.u32 %s2570_s10, 6 }
  0x55   : > { %s317_s21 = sadd.s32 %s1959_s17, %s1870_s23  ;;  %s310_s16 = scalar_lea.vmem [#allocation8], %s1867_s19 }
  0x56   : > { %s320_s4 = sshll.u32 %s310_s16, 4  ;;  %s1871_s0 = sshll.u32 %s317_s21, 7  ;;  %s321_s4 = int_to_ptr.vmem [resolvable:$true] %s320_s4 }
  0x57   : > { %s319_s20 = scalar_lea.hbm %s3387_s2, %s1871_s0  ;;  %s2431_s29 = scalar_lea.vmem %s321_s4, 4096 }
  0x58   : > { %p2432_p9 = scmp.ne.s32.totalorder %s321_s4, %s2431_s29  ;;  %s2580_s7 = smov [#allocation8]  }
  0x59   : > { %s2436_s26 = sshll.u32 %s2580_s7, 4  ;;  %s2437_s26 = int_to_ptr.vmem [resolvable:$false] %s2436_s26 }
  0x5a   : > { %p2434_p12 = pnand %p2432_p9, %p2392_p8  ;;  %s2438_s6 = scalar_lea.vmem %s2437_s26, 8192 }
  0x5b   : > { %p2439_p7 = scmp.lt.s32.totalorder %s321_s4, %s2437_s26  ;;  %p2440_p5 = scmp.lt.s32.totalorder %s2438_s6, %s2431_s29 }
  0x5c   : > { %p2435_p13 = pneg %p2434_p12 }
  0x5d   : > { %p2441_p10 = por %p2440_p5, %p2439_p7 }
  0x5f   : > { %p2442_p1 = pnand %p2441_p10, %p2435_p13 }
  0x61   : > { %2445 = shalt.err (!%p2442_p1)
}
  0x62   : > { %s2581_s8 = smov 256   ;;  %s2582_s27 = smov 16  }
  0x63   : > { %2106 = dma.hbm_to_vmem [thread:$0]  (!%p2787_p11), %s319_s20, 4096, %s321_s4, %s2713_s13, %s2581_s8, %s2581_s8, %s2582_s27  }
  0x64   : > { %332 = sbr.rel (%p2727_p4) target bundleno = 1234 (0x4d2), region = 48  ;;  %s2820_s0 = sand.u32 (!%p2727_p4), 1, %s2550_s28  }
  0x65   : > { %s1873_s7 = sshll.u32 (!%p2727_p4), %s2820_s0, 6  ;;  %s335_s26 = scalar_lea.sflag (!%p2727_p4), [#allocation4], %s2820_s0 }
  0x66   : > { %s2824_s29 = scalar_lea.vmem (!%p2727_p4), [#allocation3], %s1873_s7 }
  0x69   : > { %2517 = dma.done.wait (%p2755_p2), %s335_s26, 1024  }
  0x6a   : > { %2519 = vsyncadd (%p2755_p2), %s335_s26, 4294966272  ;;  %s343_s13 = sand.u32 1, %s2682_s12   ;;  %s345_s22 = sand.u32 1, %s2538_s25  }
  0x6b   : > { %s1874_s15 = sshll.u32 %s345_s22, 7  ;;  %s344_s19 = scalar_lea.sflag [#allocation7], %s343_s13 }
  0x6c   : > { %s2832_s1 = scalar_lea.vmem [#allocation6], %s1874_s15 }
  0x6d   : > { %2521 = dma.done.wait (%p2695_p6), %s344_s19, 2048  }
  0x6e   : > { %2523 = vsyncadd (%p2695_p6), %s344_s19, 4294965248  ;;  %s1875_s18 = sshll.u32 %s2820_s0, 8 }
  0x6f   : > { %s2839_s17 = scalar_lea.vmem [#allocation8], %s1875_s18 }
  0x70   : > { %2525 = dma.done.wait (%p2755_p2), %s344_s19, 4096  }
  0x71   : > { %2527 = vsyncadd (%p2755_p2), %s344_s19, 4294963200  ;;  %s2845_s12 = scalar_lea.vmem [#allocation9], %s1875_s18  ;;  %p1877_p4 = scmp.ne.s32.totalorder %s2558_s30, 0 }
  0x72   : > { %s3439_s23 = sld [smem:[#allocation28_spill]] (!%p1877_p4) }
  0x73   : > { %404 = sbr.rel (%p1877_p4) target bundleno = 414 (0x19e), region = 64  ;;  %s3440_s5 = sld [smem:[#allocation29_spill]] (!%p1877_p4) }
  0x78   : > { %v2211_v0 = vld [vmem:[%s2832_s1 + $0x78] sm:$0xff]   ;;  %v2583_v2 = vmov 0   ;;  %v2213_v3 = vld [vmem:[%s2832_s1 + $0x70] sm:$0xff]   ;;  %v2215_v5 = vld [vmem:[%s2832_s1 + $0x68] sm:$0xff]  }
  0x79   : > { %v2212_v1 = vld [vmem:[%s2832_s1 + $0x38] sm:$0xff]   ;;  %2210 = vset.pattern.permute.xlu1 %v2583_v2  ;;  %2209 = vset.pattern.permute.xlu0 %v2583_v2  ;;  %v2214_v4 = vld [vmem:[%s2832_s1 + $0x30] sm:$0xff]   ;;  %v2216_v6 = vld [vmem:[%s2832_s1 + $0x28] sm:$0xff]  }
  0x7a   : > { %1977 = vmatprep.subr.bf16.mxu0 %v2211_v0  ;;  %2057 = vmatprep.subr.bf16.mxu1 %v2211_v0  ;;  %v2217_v7 = vld [vmem:[%s2832_s1 + $0x60] sm:$0xff]   ;;  %v2219_v11 = vld [vmem:[%s2832_s1 + $0x58] sm:$0xff]   ;;  %v455_v12 = vld [vmem:[%s3440_s5 + $0x10] sm:$0xff] }
  0x7b   : > { %1978 = vmatpush3.bf16.xpose.msra.mxu0 %v2212_v1  ;;  %2065 = vmatpush3.bf16.xpose.msra.mxu1 %v2212_v1  ;;  %v2858_v8 = vld [vmem:[%s3439_s23] sm:$0xff]   ;;  %v456_v14 = vld [vmem:[%s3440_s5 + $0x18] sm:$0xff]  ;;  %v454_v15 = vld [vmem:[%s3440_s5 + $0x8] sm:$0xff] }
  0x7c   : > { %1979 = vmatprep.subr.bf16.mxu0 %v2213_v3  ;;  %2058 = vmatprep.subr.bf16.mxu1 %v2213_v3  ;;  %v2863_v9 = vld [vmem:[%s3439_s23 + $0x20] sm:$0xff]   ;;  %v458_v16 = vld [vmem:[%s3440_s5 + $0x28] sm:$0xff]  ;;  %v2220_v18 = vld [vmem:[%s2832_s1 + $0x18] sm:$0xff]  }
  0x7d   : > { %1993 = vmatprep.mubr.bf16.mxu0 %v2858_v8  ;;  %2001 = vmatprep.mubr.bf16.mxu1 %v2863_v9  ;;  %v2218_v10 = vld [vmem:[%s2832_s1 + $0x20] sm:$0xff]   ;;  %v2221_v19 = vld [vmem:[%s2832_s1 + $0x50] sm:$0xff]   ;;  %v460_v20 = vld [vmem:[%s3440_s5 + $0x38] sm:$0xff] }
  0x7e   : > { %v453_v13 = vld [vmem:[%s3440_s5] sm:$0xff]  ;;  %481 = vperm.xlu1 %2210, %v455_v12   ;;  %v459_v21 = vld [vmem:[%s3440_s5 + $0x30] sm:$0xff]  ;;  %v462_v22 = vld [vmem:[%s3440_s5 + $0x48] sm:$0xff] }
  0x7f   : > { %471 = vperm.xlu0 %2209, %v453_v13   ;;  %v457_v17 = vld [vmem:[%s3440_s5 + $0x20] sm:$0xff]  ;;  %v2222_v24 = vld [vmem:[%s2832_s1 + $0x10] sm:$0xff]   ;;  %v2223_v25 = vld [vmem:[%s2832_s1 + $0x48] sm:$0xff]  }
  0x80   : > { %v461_v23 = vld [vmem:[%s3440_s5 + $0x40] sm:$0xff]  ;;  %v464_v26 = vld [vmem:[%s3440_s5 + $0x58] sm:$0xff]  ;;  %v463_v27 = vld [vmem:[%s3440_s5 + $0x50] sm:$0xff] }
  0x81   : > { %v466_v28 = vld [vmem:[%s3440_s5 + $0x68] sm:$0xff]  ;;  %v465_v29 = vld [vmem:[%s3440_s5 + $0x60] sm:$0xff]  ;;  %v468_v32 = vld [vmem:[%s3440_s5 + $0x78] sm:$0xff] }
  0x82   : > { %486 = vperm.xlu1 %2210, %v456_v14   ;;  %v2224_v30 = vld [vmem:[%s2832_s1 + $0x8] sm:$0xff]   ;;  %v2225_v31 = vld [vmem:[%s2832_s1 + $0x40] sm:$0xff]   ;;  %v467_v33 = vld [vmem:[%s3440_s5 + $0x70] sm:$0xff] }
  0x83   : > { %1980 = vmatpush3.bf16.xpose.msra.mxu0 %v2214_v4  ;;  %2066 = vmatpush3.bf16.xpose.msra.mxu1 %v2214_v4  ;;  %v2226_v34 = vld [vmem:[%s2832_s1] sm:$0xff]   ;;  %v2229_v35 = vld [vmem:[%s3439_s23 + $0x8] sm:$0xff]   ;;  %v2231_v37 = vld [vmem:[%s3439_s23 + $0x10] sm:$0xff]  }
  0x84   : > { %1981 = vmatprep.subr.bf16.mxu0 %v2215_v5  ;;  %2059 = vmatprep.subr.bf16.mxu1 %v2215_v5  ;;  %v2230_v36 = vld [vmem:[%s3439_s23 + $0x28] sm:$0xff]   ;;  %v2232_v38 = vld [vmem:[%s3439_s23 + $0x30] sm:$0xff]   ;;  %v2233_v39 = vld [vmem:[%s3439_s23 + $0x18] sm:$0xff]  }
  0x85   : > { %476 = vperm.xlu0 %2209, %v454_v15   ;;  %v2234_v40 = vld [vmem:[%s3439_s23 + $0x38] sm:$0xff]  }
  0x86   : > { %496 = vperm.xlu1 %2210, %v458_v16  }
  0x89   : > { %491 = vperm.xlu0 %2209, %v457_v17  }
  0x8a   : > { %506 = vperm.xlu1 %2210, %v460_v20  }
  0x8b   : > { %1982 = vmatpush3.bf16.xpose.msra.mxu0 %v2216_v6  ;;  %2067 = vmatpush3.bf16.xpose.msra.mxu1 %v2216_v6 }
  0x8c   : > { %1983 = vmatprep.subr.bf16.mxu0 %v2217_v7  ;;  %2060 = vmatprep.subr.bf16.mxu1 %v2217_v7 }
  0x8d   : > { %501 = vperm.xlu0 %2209, %v459_v21  }
  0x8e   : > { %516 = vperm.xlu1 %2210, %v462_v22  }
  0x91   : > { %511 = vperm.xlu0 %2209, %v461_v23  }
  0x92   : > { %526 = vperm.xlu1 %2210, %v464_v26  }
  0x93   : > { %1984 = vmatpush3.bf16.xpose.msra.mxu0 %v2218_v10  ;;  %2068 = vmatpush3.bf16.xpose.msra.mxu1 %v2218_v10 }
  0x94   : > { %1985 = vmatprep.subr.bf16.mxu0 %v2219_v11  ;;  %2061 = vmatprep.subr.bf16.mxu1 %v2219_v11 }
  0x95   : > { %521 = vperm.xlu0 %2209, %v463_v27  }
  0x96   : > { %536 = vperm.xlu1 %2210, %v466_v28  }
  0x99   : > { %531 = vperm.xlu0 %2209, %v465_v29  }
  0x9a   : > { %546 = vperm.xlu1 %2210, %v468_v32  }
  0x9b   : > { %1986 = vmatpush3.bf16.xpose.msra.mxu0 %v2220_v18  ;;  %2069 = vmatpush3.bf16.xpose.msra.mxu1 %v2220_v18 }
  0x9c   : > { %1987 = vmatprep.subr.bf16.mxu0 %v2221_v19  ;;  %2062 = vmatprep.subr.bf16.mxu1 %v2221_v19 }
  0x9d   : > { %541 = vperm.xlu0 %2209, %v467_v33  }
  0xa3   : > { %1988 = vmatpush3.bf16.xpose.msra.mxu0 %v2222_v24  ;;  %2070 = vmatpush3.bf16.xpose.msra.mxu1 %v2222_v24 }
  0xa4   : > { %1989 = vmatprep.subr.bf16.mxu0 %v2223_v25  ;;  %2063 = vmatprep.subr.bf16.mxu1 %v2223_v25 }
  0xab   : > { %1990 = vmatpush3.bf16.xpose.msra.mxu0 %v2224_v30  ;;  %2071 = vmatpush3.bf16.xpose.msra.mxu1 %v2224_v30 }
  0xac   : > { %1991 = vmatprep.subr.bf16.mxu0 %v2225_v31  ;;  %2064 = vmatprep.subr.bf16.mxu1 %v2225_v31 }
  0xb3   : > { %1992 = vmatpush3.bf16.xpose.msra.mxu0 %v2226_v34  ;;  %2072 = vmatpush3.bf16.xpose.msra.mxu1 %v2226_v34 }
  0xba   : > { %1994 = vmatmul.mubr.bf16.vlgmr.msra.gmra.mxu0 %v2858_v8  ;;  %2002 = vmatmul.mubr.bf16.vlgmr.msra.gmra.mxu1 %v2863_v9 }
  0xbb   : > { %1995 = vmatprep.mubr.bf16.mxu0 %v2229_v35  ;;  %2003 = vmatprep.mubr.bf16.mxu1 %v2230_v36 }
  0xc2   : > { %1996 = vmatmul.mubr.bf16.gmra.mxu0 %v2229_v35  ;;  %2004 = vmatmul.mubr.bf16.gmra.mxu1 %v2230_v36 }
  0xc3   : > { %1997 = vmatprep.mubr.bf16.mxu0 %v2231_v37  ;;  %2005 = vmatprep.mubr.bf16.mxu1 %v2232_v38 }
  0xca   : > { %1998 = vmatmul.mubr.bf16.gmra.mxu0 %v2231_v37  ;;  %2006 = vmatmul.mubr.bf16.gmra.mxu1 %v2232_v38 }
  0xcb   : > { %1999 = vmatprep.mubr.bf16.mxu0 %v2233_v39  ;;  %2007 = vmatprep.mubr.bf16.mxu1 %v2234_v40 }
  0xd2   : > { %2000 = vmatmul.mubr.bf16.gmra.mxu0 %v2233_v39  ;;  %2008 = vmatmul.mubr.bf16.gmra.mxu1 %v2234_v40 }
  0xf9   : > { %v482_v42 = vpop.permute.xlu1 %481 }
  0xfa   : > { %v472_v41 = vpop.permute.xlu0 %471 }
  0xfd   : > { %v487_v44 = vpop.permute.xlu1 %486 }
 0x100   : > { %v477_v43 = vpop.permute.xlu0 %476 }
 0x101   : > { %v2946_v46 = vpop.permute.xlu1 %496 }
 0x104   : > { %v2944_v45 = vpop.permute.xlu0 %491 }
 0x105   : > { %v2950_v48 = vpop.permute.xlu1 %506 }
 0x108   : > { %v2948_v47 = vpop.permute.xlu0 %501 }
 0x109   : > { %v517_v60 = vpop.permute.xlu1 %516 }
 0x10c   : > { %v512_v51 = vpop.permute.xlu0 %511 }
 0x10d   : > { %v527_v18 = vpop.permute.xlu1 %526 }
 0x110   : > { %v522_v7 = vpop.permute.xlu0 %521 }
 0x111   : > { %v537_v40 = vpop.permute.xlu1 %536 }
 0x114   : > { %v532_v29 = vpop.permute.xlu0 %531 }
 0x17a   : > { %v727_v49 = vpop.f32.mrf.mxu0  ;;  %v767_v50 = vpop.f32.mrf.mxu1 }
 0x17b   : > { %v728_v54 = vadd.f32 %v727_v49, %v472_v41  ;;  %v768_v55 = vadd.f32 %v767_v50, %v512_v51 }
 0x17c   : > { %v729_v52 = vpop.f32.mrf.mxu0  ;;  %v769_v53 = vpop.f32.mrf.mxu1 }
 0x17d   : > { %v730_v56 = vadd.f32 %v729_v52, %v472_v41  ;;  %v770_v57 = vadd.f32 %v769_v53, %v512_v51 }
 0x17e   : > { %v731_v58 = vpop.f32.mrf.mxu0  ;;  %v771_v59 = vpop.f32.mrf.mxu1 }
 0x17f   : > { %v1960_v61 = vpack.c.bf16 %v730_v56, %v728_v54  ;;  %v1968_v62 = vpack.c.bf16 %v770_v57, %v768_v55  ;;  %v732_v1 = vadd.f32 %v731_v58, %v477_v43  ;;  %v772_v2 = vadd.f32 %v771_v59, %v517_v60  ;;  %v542_v55 = vpop.permute.xlu0 %541 }
 0x180   : > { %v733_v63 = vpop.f32.mrf.mxu0  ;;  %v773_v0 = vpop.f32.mrf.mxu1 }
 0x181   : > { %902 = vst [vmem:[#allocation2 + $0x30] sm:$0xff] %v1960_v61  ;;  %910 = vst [vmem:[#allocation2 + $0x40] sm:$0xff] %v1968_v62  ;;  %v734_v3 = vadd.f32 %v733_v63, %v477_v43  ;;  %v774_v4 = vadd.f32 %v773_v0, %v517_v60 }
 0x182   : > { %v737_v5 = vpop.f32.mrf.mxu0  ;;  %v777_v6 = vpop.f32.mrf.mxu1 }
 0x183   : > { %v1961_v8 = vpack.c.bf16 %v734_v3, %v732_v1  ;;  %v1969_v9 = vpack.c.bf16 %v774_v4, %v772_v2  ;;  %v738_v12 = vadd.f32 %v737_v5, %v482_v42  ;;  %v778_v13 = vadd.f32 %v777_v6, %v522_v7  ;;  %v547_v1 = vpop.permute.xlu1 %546 }
 0x184   : > { %v739_v10 = vpop.f32.mrf.mxu0  ;;  %v779_v11 = vpop.f32.mrf.mxu1 }
 0x185   : > { %903 = vst [vmem:[#allocation2] sm:$0xff] %v1961_v8  ;;  %911 = vst [vmem:[#allocation2 + $0x20] sm:$0xff] %v1969_v9  ;;  %v740_v14 = vadd.f32 %v739_v10, %v482_v42  ;;  %v780_v15 = vadd.f32 %v779_v11, %v522_v7 }
 0x186   : > { %v741_v16 = vpop.f32.mrf.mxu0  ;;  %v781_v17 = vpop.f32.mrf.mxu1 }
 0x187   : > { %v1962_v19 = vpack.c.bf16 %v740_v14, %v738_v12  ;;  %v1970_v20 = vpack.c.bf16 %v780_v15, %v778_v13  ;;  %v742_v23 = vadd.f32 %v741_v16, %v487_v44  ;;  %v782_v24 = vadd.f32 %v781_v17, %v527_v18 }
 0x188   : > { %v743_v21 = vpop.f32.mrf.mxu0  ;;  %v783_v22 = vpop.f32.mrf.mxu1 }
 0x189   : > { %904 = vst [vmem:[#allocation2 + $0x58] sm:$0xff] %v1962_v19  ;;  %912 = vst [vmem:[#allocation2 + $0x10] sm:$0xff] %v1970_v20  ;;  %v744_v25 = vadd.f32 %v743_v21, %v487_v44  ;;  %v784_v26 = vadd.f32 %v783_v22, %v527_v18 }
 0x18a   : > { %v747_v27 = vpop.f32.mrf.mxu0  ;;  %v787_v28 = vpop.f32.mrf.mxu1 }
 0x18b   : > { %v1963_v30 = vpack.c.bf16 %v744_v25, %v742_v23  ;;  %v1971_v31 = vpack.c.bf16 %v784_v26, %v782_v24  ;;  %v748_v34 = vadd.f32 %v747_v27, %v2944_v45  ;;  %v788_v35 = vadd.f32 %v787_v28, %v532_v29 }
 0x18c   : > { %v749_v32 = vpop.f32.mrf.mxu0  ;;  %v789_v33 = vpop.f32.mrf.mxu1 }
 0x18d   : > { %905 = vst [vmem:[#allocation2 + $0x18] sm:$0xff] %v1963_v30  ;;  %913 = vst [vmem:[#allocation2 + $0x38] sm:$0xff] %v1971_v31  ;;  %v750_v36 = vadd.f32 %v749_v32, %v2944_v45  ;;  %v790_v37 = vadd.f32 %v789_v33, %v532_v29 }
 0x18e   : > { %v751_v38 = vpop.f32.mrf.mxu0  ;;  %v791_v39 = vpop.f32.mrf.mxu1 }
 0x18f   : > { %v1964_v41 = vpack.c.bf16 %v750_v36, %v748_v34  ;;  %v1972_v42 = vpack.c.bf16 %v790_v37, %v788_v35  ;;  %v752_v49 = vadd.f32 %v751_v38, %v2946_v46  ;;  %v792_v50 = vadd.f32 %v791_v39, %v537_v40 }
 0x190   : > { %v753_v43 = vpop.f32.mrf.mxu0  ;;  %v793_v44 = vpop.f32.mrf.mxu1 }
 0x191   : > { %906 = vst [vmem:[#allocation2 + $0x50] sm:$0xff] %v1964_v41  ;;  %914 = vst [vmem:[#allocation2 + $0x60] sm:$0xff] %v1972_v42  ;;  %v754_v51 = vadd.f32 %v753_v43, %v2946_v46  ;;  %v794_v52 = vadd.f32 %v793_v44, %v537_v40 }
 0x192   : > { %v757_v53 = vpop.f32.mrf.mxu0  ;;  %v797_v54 = vpop.f32.mrf.mxu1 }
 0x193   : > { %v1965_v45 = vpack.c.bf16 %v754_v51, %v752_v49  ;;  %v1973_v56 = vpack.c.bf16 %v794_v52, %v792_v50  ;;  %v758_v59 = vadd.f32 %v757_v53, %v2948_v47  ;;  %v798_v60 = vadd.f32 %v797_v54, %v542_v55 }
 0x194   : > { %v759_v57 = vpop.f32.mrf.mxu0  ;;  %v799_v58 = vpop.f32.mrf.mxu1 }
 0x195   : > { %907 = vst [vmem:[#allocation2 + $0x68] sm:$0xff] %v1965_v45  ;;  %915 = vst [vmem:[#allocation2 + $0x70] sm:$0xff] %v1973_v56  ;;  %v760_v61 = vadd.f32 %v759_v57, %v2948_v47  ;;  %v800_v62 = vadd.f32 %v799_v58, %v542_v55 }
 0x196   : > { %v761_v63 = vpop.f32.mrf.mxu0  ;;  %v801_v0 = vpop.f32.mrf.mxu1 }
 0x197   : > { %v1966_v46 = vpack.c.bf16 %v760_v61, %v758_v59  ;;  %v1974_v2 = vpack.c.bf16 %v800_v62, %v798_v60  ;;  %v762_v5 = vadd.f32 %v761_v63, %v2950_v48  ;;  %v802_v6 = vadd.f32 %v801_v0, %v547_v1 }
 0x198   : > { %v763_v3 = vpop.f32.mrf.mxu0  ;;  %v803_v4 = vpop.f32.mrf.mxu1 }
 0x199   : > { %908 = vst [vmem:[#allocation2 + $0x8] sm:$0xff] %v1966_v46  ;;  %916 = vst [vmem:[#allocation2 + $0x78] sm:$0xff] %v1974_v2  ;;  %v764_v7 = vadd.f32 %v763_v3, %v2950_v48  ;;  %v804_v8 = vadd.f32 %v803_v4, %v547_v1 }
 0x19b   : > { %v1967_v9 = vpack.c.bf16 %v764_v7, %v762_v5  ;;  %v1975_v10 = vpack.c.bf16 %v804_v8, %v802_v6 }
 0x19d   : > { %909 = vst [vmem:[#allocation2 + $0x48] sm:$0xff] %v1967_v9  ;;  %917 = vst [vmem:[#allocation2 + $0x28] sm:$0xff] %v1975_v10 }
 0x19e PF: > { %s3441_s19 = sld [smem:[#allocation26_spill]]  ;;  %v2243_v13 = vld [vmem:[%s2824_s29] sm:$0xff]   ;;  %v2259_v21 = vld [vmem:[#allocation2 + $0x14] ss:$40 sps:$4 sm:$0xff]   ;;  %v2257_v25 = vld [vmem:[#allocation2 + $0x10] ss:$40 sps:$4 sm:$0xff]  }
 0x19f   : > { %2041 = vmatprep.mubr.bf16.mxu0 %v2243_v13  ;;  %v2256_v18 = vld [vmem:[#allocation2 + $0x64] ss:$16 sps:$4 sm:$0xff]   ;;  %v2254_v20 = vld [vmem:[#allocation2 + $0x60] ss:$16 sps:$4 sm:$0xff]   ;;  %v2244_v29 = vld [vmem:[%s2824_s29 + $0x8] sm:$0xff]   ;;  %v2584_v51 = vmov 0  }
 0x1a0   : > { %v1166_v23 = vld [vmem:[#allocation2 + $0x40] sm:$0xff]  ;;  %v1164_v27 = vld [vmem:[#allocation2 + $0x8] sm:$0xff]  ;;  %v2245_v31 = vld [vmem:[%s2824_s29 + $0x10] sm:$0xff]   ;;  %1306 = vmatprep.mubr.bf16.mxu1 %v2584_v51  ;;  %s3442_s22 = sld [smem:[#allocation27_spill]]  ;;  %s1976_s18 = sshll.u32 %s2558_s30, 5 }
 0x1a1   : > { %v1167_v24 = vld [vmem:[#allocation2 + $0x20] sm:$0xff]  ;;  %v2262_v34 = vld [vmem:[#allocation2 + $0x54] ss:$24 sps:$4 sm:$0xff]   ;;  %v2246_v35 = vld [vmem:[%s2824_s29 + $0x18] sm:$0xff]   ;;  %s3443_s15 = sld [smem:[#allocation17_spill]]  ;;  %s1720_s30 = sshll.u32 %s2845_s12, 4  ;;  %s3316_s30 = int_to_ptr.vmem [resolvable:$true] %s1720_s30 }
 0x1a2   : > { %v1944_v26 = vcombine.high %v1166_v23, %v1167_v24  ;;  %v1943_v30 = vcombine.low %v1166_v23, %v1167_v24  ;;  %v2260_v36 = vld [vmem:[#allocation2 + $0x50] ss:$24 sps:$4 sm:$0xff]   ;;  %v2247_v37 = vld [vmem:[%s2824_s29 + $0x20] sm:$0xff]   ;;  %v2250_v40 = vld [vmem:[%s2824_s29 + $0x38] sm:$0xff]   ;;  %s3445_s20 = sld [smem:[#allocation30_spill]]  ;;  %s2446_s1 = scalar_lea.vmem %s3316_s30, 4096 }
 0x1a3   : > { %v2248_v38 = vld [vmem:[%s2824_s29 + $0x28] sm:$0xff]   ;;  %v2249_v39 = vld [vmem:[%s2824_s29 + $0x30] sm:$0xff]   ;;  %v1160_v41 = vld [vmem:[#allocation2 + $0x58] sm:$0xff]  ;;  %p2447_p6 = scmp.ne.s32.totalorder %s3316_s30, %s2446_s1  ;;  %s2585_s8 = smov [#allocation9]  }
 0x1a4   : > { %v2235_v47 = vld [vmem:[%s3441_s19 + $0x38] sm:$0xff]   ;;  %v2236_v11 = vld [vmem:[%s3441_s19 + $0x30] sm:$0xff]   ;;  %v2237_v48 = vld [vmem:[%s3441_s19 + $0x28] sm:$0xff]   ;;  %s2450_s27 = sshll.u32 %s2585_s8, 4  ;;  %s2451_s27 = int_to_ptr.vmem [resolvable:$false] %s2450_s27 }
 0x1a5   : > { %2025 = vmatprep.subr.bf16.mxu0 %v2235_v47  ;;  %v2238_v12 = vld [vmem:[%s3441_s19 + $0x20] sm:$0xff]   ;;  %v2239_v14 = vld [vmem:[%s3441_s19 + $0x18] sm:$0xff]   ;;  %v2240_v15 = vld [vmem:[%s3441_s19 + $0x10] sm:$0xff]   ;;  %p2448_p2 = pnand %p2447_p6, %p2759_p3  ;;  %s2452_s7 = scalar_lea.vmem %s2451_s27, 8192 }
 0x1a6   : > { %2026 = vmatpush3.bf16.msra.mxu0 %v2235_v47  ;;  %v2253_v16 = vld [vmem:[#allocation2 + $0x7c] ss:$-80 sps:$4 sm:$0xff]   ;;  %v2251_v17 = vld [vmem:[#allocation2 + $0x78] ss:$-80 sps:$4 sm:$0xff]   ;;  %v2242_v22 = vld [vmem:[%s3441_s19] sm:$0xff]   ;;  %p2453_p8 = scmp.lt.s32.totalorder %s3316_s30, %s2451_s27  ;;  %p2454_p9 = scmp.lt.s32.totalorder %s2452_s7, %s2446_s1 }
 0x1a7   : > { %2027 = vmatprep.subr.bf16.mxu0 %v2236_v11  ;;  %2073 = vmatprep.subr.bf16.mxu1 %v2253_v16  ;;  %v2241_v19 = vld [vmem:[%s3441_s19 + $0x8] sm:$0xff]   ;;  %v1161_v42 = vld [vmem:[#allocation2 + $0x18] sm:$0xff]  ;;  %v2265_v49 = vld [vmem:[#allocation2 + $0x34] ss:$-48 sps:$4 sm:$0xff]   ;;  %s1954_s14 = sshll.u32 %s3443_s15, 6  ;;  %p2449_p11 = pneg %p2448_p2 }
 0x1a8   : > { %2081 = vmatpush1.bf16.msra.mxu1 %v2251_v17  ;;  %v1165_v28 = vld [vmem:[#allocation2 + $0x48] sm:$0xff]  ;;  %v1938_v43 = vcombine.high %v1160_v41, %v1161_v42  ;;  %v1937_v44 = vcombine.low %v1160_v41, %v1161_v42  ;;  %v2263_v50 = vld [vmem:[#allocation2 + $0x30] ss:$-48 sps:$4 sm:$0xff]   ;;  %s1717_s24 = sadd.s32 %s1976_s18, %s1954_s14  ;;  %p2455_p12 = por %p2454_p9, %p2453_p8 }
 0x1a9   : > { %2074 = vmatprep.subr.bf16.mxu1 %v2256_v18  ;;  %v1942_v32 = vcombine.high %v1164_v27, %v1165_v28  ;;  %v1941_v33 = vcombine.low %v1164_v27, %v1165_v28  ;;  %v1918_v55 = vld [vmem:[%s3442_s22] ss:$0 sm:$0xff]  ;;  %s1955_s16 = sshll.u32 %s1717_s24, 7 }
 0x1aa   : > { %2028 = vmatpush3.bf16.msra.mxu0 %v2236_v11  ;;  %s3321_s6 = scalar_lea.hbm %s3445_s20, %s1955_s16  ;;  %p2456_p13 = pnand %p2455_p12, %p2449_p11 }
 0x1ab   : > { %2029 = vmatprep.subr.bf16.mxu0 %v2237_v48 }
 0x1ac   : > { %2082 = vmatpush1.bf16.msra.mxu1 %v2254_v20 }
 0x1ad   : > { %2075 = vmatprep.subr.bf16.mxu1 %v2259_v21 }
 0x1ae   : > { %2030 = vmatpush3.bf16.msra.mxu0 %v2237_v48 }
 0x1af   : > { %2031 = vmatprep.subr.bf16.mxu0 %v2238_v12 }
 0x1b0   : > { %2083 = vmatpush1.bf16.msra.mxu1 %v2257_v25 }
 0x1b1   : > { %2076 = vmatprep.subr.bf16.mxu1 %v1944_v26 }
 0x1b2   : > { %2032 = vmatpush3.bf16.msra.mxu0 %v2238_v12 }
 0x1b3   : > { %2033 = vmatprep.subr.bf16.mxu0 %v2239_v14 }
 0x1b4   : > { %2084 = vmatpush1.bf16.msra.mxu1 %v1943_v30 }
 0x1b5   : > { %2077 = vmatprep.subr.bf16.mxu1 %v1942_v32 }
 0x1b6   : > { %2034 = vmatpush3.bf16.msra.mxu0 %v2239_v14 }
 0x1b7   : > { %2035 = vmatprep.subr.bf16.mxu0 %v2240_v15 }
 0x1b8   : > { %2085 = vmatpush1.bf16.msra.mxu1 %v1941_v33 }
 0x1b9   : > { %2078 = vmatprep.subr.bf16.mxu1 %v2262_v34 }
 0x1ba   : > { %2036 = vmatpush3.bf16.msra.mxu0 %v2240_v15 }
 0x1bb   : > { %2037 = vmatprep.subr.bf16.mxu0 %v2241_v19 }
 0x1bc   : > { %2086 = vmatpush1.bf16.msra.mxu1 %v2260_v36 }
 0x1bd   : > { %2079 = vmatprep.subr.bf16.mxu1 %v1938_v43 }
 0x1be   : > { %2038 = vmatpush3.bf16.msra.mxu0 %v2241_v19 }
 0x1bf   : > { %2039 = vmatprep.subr.bf16.mxu0 %v2242_v22 }
 0x1c0   : > { %2087 = vmatpush1.bf16.msra.mxu1 %v1937_v44 }
 0x1c1   : > { %2080 = vmatprep.subr.bf16.mxu1 %v2265_v49 }
 0x1c2   : > { %2040 = vmatpush3.bf16.msra.mxu0 %v2242_v22 }
 0x1c3   : > { %1254 = vmatprep.subr.bf16.mxu0 %v2253_v16 }
 0x1c4   : > { %2088 = vmatpush1.bf16.msra.mxu1 %v2263_v50 }
 0x1c5   : > { %2042 = vmatmul.mubr.bf16.vlgmr.msra.gmra.mxu0 %v2244_v29 }
 0x1c6   : > { %2045 = vmatprep.mubr.bf16.mxu0 %v2245_v31  ;;  %1255 = vmatpush1.bf16.msra.mxu0 %v2251_v17 }
 0x1c7   : > { %1256 = vmatprep.subr.bf16.mxu0 %v2256_v18 }
 0x1ca   : > { %1257 = vmatpush1.bf16.msra.mxu0 %v2254_v20 }
 0x1cb   : > { %1258 = vmatprep.subr.bf16.mxu0 %v2259_v21 }
 0x1cd   : > { %2046 = vmatmul.mubr.bf16.gmra.mxu0 %v2246_v35 }
 0x1ce   : > { %2049 = vmatprep.mubr.bf16.mxu0 %v2247_v37  ;;  %1259 = vmatpush1.bf16.msra.mxu0 %v2257_v25 }
 0x1cf   : > { %1260 = vmatprep.subr.bf16.mxu0 %v1944_v26 }
 0x1d2   : > { %1261 = vmatpush1.bf16.msra.mxu0 %v1943_v30 }
 0x1d3   : > { %1262 = vmatprep.subr.bf16.mxu0 %v1942_v32 }
 0x1d5   : > { %2050 = vmatmul.mubr.bf16.gmra.mxu0 %v2248_v38 }
 0x1d6   : > { %2053 = vmatprep.mubr.bf16.mxu0 %v2249_v39  ;;  %1263 = vmatpush1.bf16.msra.mxu0 %v1941_v33 }
 0x1d7   : > { %1264 = vmatprep.subr.bf16.mxu0 %v2262_v34 }
 0x1da   : > { %1265 = vmatpush1.bf16.msra.mxu0 %v2260_v36 }
 0x1db   : > { %1266 = vmatprep.subr.bf16.mxu0 %v1938_v43 }
 0x1dd   : > { %2054 = vmatmul.mubr.bf16.gmra.mxu0 %v2250_v40 }
 0x1de   : > { %1267 = vmatpush1.bf16.msra.mxu0 %v1937_v44  ;;  %1286 = vmatprep.mubr.bf16.mxu0 %v2584_v51 }
 0x1df   : > { %1268 = vmatprep.subr.bf16.mxu0 %v2265_v49 }
 0x1e2   : > { %1269 = vmatpush1.bf16.msra.mxu0 %v2263_v50 }
 0x285   : > { %v2043_v52 = vpop.f32.mrf.mxu0 }
 0x286   : > { %v1096_v0 = vadd.f32 %v2043_v52, %v1918_v55 }
 0x287   : > { %v1087_v53 = vpop.f32.mrf.mxu0 }
 0x288   : > { %v1088_v56 = vadd.f32 %v1918_v55, %v1087_v53 }
 0x289   : > { %v2044_v54 = vpop.f32.mrf.mxu0 }
 0x28a   : > { %v1099_v62 = vadd.f32 %v2044_v54, %v1918_v55 }
 0x28b   : > { %v1090_v45 = vpop.f32.mrf.mxu0 }
 0x28c   : > { %v1091_v57 = vadd.f32 %v1918_v55, %v1090_v45  ;;  %v1151_v3 = vpack.c.bf16 %v1099_v62, %v1096_v0 }
 0x28d   : > { %v2047_v58 = vpop.f32.mrf.mxu0 }
 0x28e   : > { %v1150_v59 = vpack.c.bf16 %v1091_v57, %v1088_v56  ;;  %v1112_v8 = vadd.f32 %v2047_v58, %v1918_v55 }
 0x28f   : > { %v1103_v60 = vpop.f32.mrf.mxu0 }
 0x290   : > { %1287 = vmatmul.mubr.bf16.vlgmr.msra.gmra.mxu0 %v1150_v59  ;;  %v1104_v1 = vadd.f32 %v1918_v55, %v1103_v60 }
 0x291   : > { %v2048_v61 = vpop.f32.mrf.mxu0  ;;  %1296 = vmatprep.mubr.bf16.mxu0 %v2584_v51 }
 0x292   : > { %v1115_v6 = vadd.f32 %v2048_v61, %v1918_v55 }
 0x293   : > { %v1106_v63 = vpop.f32.mrf.mxu0 }
 0x294   : > { %v1107_v46 = vadd.f32 %v1918_v55, %v1106_v63  ;;  %v1153_v9 = vpack.c.bf16 %v1115_v6, %v1112_v8 }
 0x295   : > { %v2051_v2 = vpop.f32.mrf.mxu0 }
 0x296   : > { %v1152_v4 = vpack.c.bf16 %v1107_v46, %v1104_v1  ;;  %v1128_v14 = vadd.f32 %v2051_v2, %v1918_v55 }
 0x297   : > { %v1119_v5 = vpop.f32.mrf.mxu0 }
 0x298   : > { %1297 = vmatmul.mubr.bf16.gmra.mxu0 %v1151_v3  ;;  %1307 = vmatmul.mubr.bf16.vlgmr.msra.gmra.mxu1 %v1152_v4  ;;  %v1120_v47 = vadd.f32 %v1918_v55, %v1119_v5 }
 0x299   : > { %1316 = vmatprep.mubr.bf16.mxu1 %v2584_v51  ;;  %v2052_v7 = vpop.f32.mrf.mxu0 }
 0x29a   : > { %v1131_v15 = vadd.f32 %v2052_v7, %v1918_v55 }
 0x29b   : > { %v1122_v10 = vpop.f32.mrf.mxu0 }
 0x29c   : > { %v1123_v11 = vadd.f32 %v1918_v55, %v1122_v10  ;;  %v1155_v17 = vpack.c.bf16 %v1131_v15, %v1128_v14 }
 0x29d   : > { %v2055_v48 = vpop.f32.mrf.mxu0 }
 0x29e   : > { %v1154_v12 = vpack.c.bf16 %v1123_v11, %v1120_v47  ;;  %v1144_v22 = vadd.f32 %v2055_v48, %v1918_v55 }
 0x29f   : > { %v1135_v13 = vpop.f32.mrf.mxu0 }
 0x2a0   : > { %1317 = vmatmul.mubr.bf16.gmra.mxu1 %v1153_v9  ;;  %v1136_v19 = vadd.f32 %v1918_v55, %v1135_v13 }
 0x2a1   : > { %1326 = vmatprep.mubr.bf16.mxu1 %v2584_v51  ;;  %v2056_v16 = vpop.f32.mrf.mxu0 }
 0x2a2   : > { %v1147_v23 = vadd.f32 %v2056_v16, %v1918_v55 }
 0x2a3   : > { %v1138_v18 = vpop.f32.mrf.mxu0 }
 0x2a4   : > { %v1139_v20 = vadd.f32 %v1918_v55, %v1138_v18  ;;  %v1157_v24 = vpack.c.bf16 %v1147_v23, %v1144_v22 }
 0x2a6   : > { %v1156_v21 = vpack.c.bf16 %v1139_v20, %v1136_v19 }
 0x2a8   : > { %1327 = vmatmul.mubr.bf16.gmra.mxu1 %v1154_v12 }
 0x2a9   : > { %1336 = vmatprep.mubr.bf16.mxu1 %v2584_v51 }
 0x2b0   : > { %1337 = vmatmul.mubr.bf16.gmra.mxu1 %v1155_v17 }
 0x2b1   : > { %1346 = vmatprep.mubr.bf16.mxu1 %v2584_v51 }
 0x2b8   : > { %1347 = vmatmul.mubr.bf16.gmra.mxu1 %v1156_v21 }
 0x2b9   : > { %1356 = vmatprep.mubr.bf16.mxu1 %v2584_v51 }
 0x2c0   : > { %1357 = vmatmul.mubr.bf16.gmra.mxu1 %v1157_v24 }
 0x350   : > { %v2995_v25 = vpop.f32.mrf.mxu0 }
 0x352   : > { %v2997_v26 = vpop.f32.mrf.mxu0 }
 0x353   : > { %v1367_v27 = vmax.f32 %v2995_v25, %v2997_v26 }
 0x354   : > { %v3001_v28 = vpop.f32.mrf.mxu0 }
 0x355   : > { %1368 = vmax.xlane.f32.xlu0 %v1367_v27 }
 0x356   : > { %v3003_v29 = vpop.f32.mrf.mxu0 }
 0x357   : > { %v1370_v30 = vmax.f32 %v3001_v28, %v3003_v29 }
 0x358   : > { %v3007_v31 = vpop.f32.mrf.mxu0  ;;  %v3009_v32 = vpop.f32.mrf.mxu1 }
 0x359   : > { %1371 = vmax.xlane.f32.xlu0 %v1370_v30 }
 0x35a   : > { %v3011_v33 = vpop.f32.mrf.mxu0  ;;  %v3013_v34 = vpop.f32.mrf.mxu1 }
 0x35b   : > { %v1379_v35 = vmax.f32 %v3009_v32, %v3013_v34  ;;  %v1373_v36 = vmax.f32 %v3007_v31, %v3011_v33 }
 0x35c   : > { %v3019_v37 = vpop.f32.mrf.mxu0  ;;  %v3021_v38 = vpop.f32.mrf.mxu1 }
 0x35d   : > { %1380 = vmax.xlane.f32.xlu0 %v1379_v35  ;;  %1374 = vmax.xlane.f32.xlu1 %v1373_v36 }
 0x35e   : > { %v3023_v39 = vpop.f32.mrf.mxu0  ;;  %v3025_v40 = vpop.f32.mrf.mxu1 }
 0x35f   : > { %v1376_v41 = vmax.f32 %v3019_v37, %v3023_v39  ;;  %v1382_v49 = vmax.f32 %v3021_v38, %v3025_v40 }
 0x360   : > { %v3029_v42 = vpop.f32.mrf.mxu1 }
 0x361   : > { %1377 = vmax.xlane.f32.xlu1 %v1376_v41 }
 0x362   : > { %v3031_v43 = vpop.f32.mrf.mxu1 }
 0x363   : > { %v1385_v44 = vmax.f32 %v3029_v42, %v3031_v43 }
 0x364   : > { %v3037_v50 = vpop.f32.mrf.mxu1 }
 0x365   : > { %1386 = vmax.xlane.f32.xlu0 %v1385_v44  ;;  %1383 = vmax.xlane.f32.xlu1 %v1382_v49 }
 0x366   : > { %v3039_v51 = vpop.f32.mrf.mxu1 }
 0x367   : > { %v1388_v52 = vmax.f32 %v3037_v50, %v3039_v51 }
 0x368   : > { %v3043_v53 = vpop.f32.mrf.mxu1 }
 0x369   : > { %1389 = vmax.xlane.f32.xlu1 %v1388_v52 }
 0x36a   : > { %v3045_v54 = vpop.f32.mrf.mxu1 }
 0x36b   : > { %v1391_v55 = vmax.f32 %v3043_v53, %v3045_v54 }
 0x36c   : > { %v3049_v45 = vpop.f32.mrf.mxu1 }
 0x36d   : > { %1392 = vmax.xlane.f32.xlu0 %v1391_v55 }
 0x36e   : > { %v3051_v56 = vpop.f32.mrf.mxu1 }
 0x36f   : > { %v1394_v57 = vmax.f32 %v3049_v45, %v3051_v56 }
 0x370   : > { %v3055_v58 = vpop.f32.mrf.mxu1 }
 0x371   : > { %1395 = vmax.xlane.f32.xlu1 %v1394_v57 }
 0x372   : > { %v3057_v59 = vpop.f32.mrf.mxu1 }
 0x373   : > { %v1397_v60 = vmax.f32 %v3055_v58, %v3057_v59 }
 0x374   : > { %v3061_v61 = vpop.f32.mrf.mxu1 }
 0x375   : > { %1398 = vmax.xlane.f32.xlu0 %v1397_v60 }
 0x376   : > { %v3063_v62 = vpop.f32.mrf.mxu1 }
 0x377   : > { %v1400_v63 = vmax.f32 %v3061_v61, %v3063_v62 }
 0x378   : > { %v3067_v0 = vpop.f32.mrf.mxu1 }
 0x379   : > { %1401 = vmax.xlane.f32.xlu1 %v1400_v63 }
 0x37a   : > { %v3069_v1 = vpop.f32.mrf.mxu1 }
 0x37b   : > { %v1403_v46 = vmax.f32 %v3067_v0, %v3069_v1 }
 0x37c   : > { %v3073_v2 = vpop.f32.mrf.mxu1 }
 0x37d   : > { %1404 = vmax.xlane.f32.xlu0 %v1403_v46 }
 0x37e   : > { %v3075_v3 = vpop.f32.mrf.mxu1 }
 0x37f   : > { %v1406_v4 = vmax.f32 %v3073_v2, %v3075_v3 }
 0x380   : > { %v3079_v5 = vpop.f32.mrf.mxu1 }
 0x381   : > { %1407 = vmax.xlane.f32.xlu1 %v1406_v4 }
 0x382   : > { %v3081_v6 = vpop.f32.mrf.mxu1 }
 0x383   : > { %v1409_v7 = vmax.f32 %v3079_v5, %v3081_v6 }
 0x384   : > { %v3085_v8 = vpop.f32.mrf.mxu1 }
 0x385   : > { %1410 = vmax.xlane.f32.xlu0 %v1409_v7 }
 0x386   : > { %v3087_v9 = vpop.f32.mrf.mxu1 }
 0x387   : > { %v1412_v10 = vmax.f32 %v3085_v8, %v3087_v9 }
 0x389   : > { %1413 = vmax.xlane.f32.xlu1 %v1412_v10 }
 0x3de   : > { %v1369_v47 = vpop.xlane.xlu0 %1368 }
 0x3df   : > { %v1415_v11 = vsub.f32 %v2995_v25, %v1369_v47  ;;  %v1416_v48 = vsub.f32 %v2997_v26, %v1369_v47 }
 0x3e1   : > { %v1447_v12 = vmul.f32 1.442695, %v1415_v11  ;;  %v1449_v13 = vmul.f32 1.442695, %v1416_v48 }
 0x3e2   : > { %v1372_v14 = vpop.xlane.xlu0 %1371 }
 0x3e3   : > { %2266 = vpow2.f32 %v1447_v12  ;;  %v1417_v15 = vsub.f32 %v3001_v28, %v1372_v14  ;;  %v1418_v16 = vsub.f32 %v3003_v29, %v1372_v14 }
 0x3e4   : > { %2268 = vpow2.f32 %v1449_v13 }
 0x3e5   : > { %v1451_v17 = vmul.f32 1.442695, %v1417_v15  ;;  %v1453_v18 = vmul.f32 1.442695, %v1418_v16 }
 0x3e6   : > { %v1381_v19 = vpop.xlane.xlu0 %1380  ;;  %v1375_v20 = vpop.xlane.xlu1 %1374 }
 0x3e7   : > { %2270 = vpow2.f32 %v1451_v17  ;;  %v1423_v21 = vsub.f32 %v3009_v32, %v1381_v19  ;;  %v1424_v22 = vsub.f32 %v3013_v34, %v1381_v19  ;;  %v1419_v23 = vsub.f32 %v3007_v31, %v1375_v20 }
 0x3e8   : > { %2272 = vpow2.f32 %v1453_v18  ;;  %v1420_v24 = vsub.f32 %v3011_v33, %v1375_v20 }
 0x3e9   : > { %v1463_v25 = vmul.f32 1.442695, %v1423_v21  ;;  %v1465_v26 = vmul.f32 1.442695, %v1424_v22  ;;  %v1455_v27 = vmul.f32 1.442695, %v1419_v23 }
 0x3ea   : > { %v1457_v28 = vmul.f32 1.442695, %v1420_v24  ;;  %v1378_v29 = vpop.xlane.xlu1 %1377 }
 0x3eb   : > { %2274 = vpow2.f32 %v1463_v25  ;;  %v1421_v30 = vsub.f32 %v3019_v37, %v1378_v29  ;;  %v1422_v35 = vsub.f32 %v3023_v39, %v1378_v29 }
 0x3ec   : > { %2276 = vpow2.f32 %v1465_v26 }
 0x3ed   : > { %2278 = vpow2.f32 %v1455_v27  ;;  %v1459_v32 = vmul.f32 1.442695, %v1421_v30  ;;  %v1461_v36 = vmul.f32 1.442695, %v1422_v35 }
 0x3ee   : > { %2280 = vpow2.f32 %v1457_v28  ;;  %v1387_v34 = vpop.xlane.xlu0 %1386  ;;  %v1384_v31 = vpop.xlane.xlu1 %1383 }
 0x3ef   : > { %2282 = vpow2.f32 %v1459_v32  ;;  %v1427_v33 = vsub.f32 %v3029_v42, %v1387_v34  ;;  %v1428_v41 = vsub.f32 %v3031_v43, %v1387_v34  ;;  %v1425_v44 = vsub.f32 %v3021_v38, %v1384_v31 }
 0x3f0   : > { %v3104_v49 = vpop.eup %2266  ;;  %2284 = vpow2.f32 %v1461_v36  ;;  %v1426_v37 = vsub.f32 %v3025_v40, %v1384_v31 }
 0x3f1   : > { %v3107_v39 = vpop.eup %2268  ;;  %v1471_v52 = vmul.f32 1.442695, %v1427_v33  ;;  %v1473_v55 = vmul.f32 1.442695, %v1428_v41  ;;  %v1467_v57 = vmul.f32 1.442695, %v1425_v44 }
 0x3f2   : > { %v1469_v60 = vmul.f32 1.442695, %v1426_v37  ;;  %v1390_v63 = vpop.xlane.xlu1 %1389  ;;  %v1511_v46 = vadd.f32 %v3107_v39, %v3104_v49 }
 0x3f3   : > { %2286 = vpow2.f32 %v1471_v52  ;;  %v1429_v42 = vsub.f32 %v3037_v50, %v1390_v63  ;;  %v1430_v38 = vsub.f32 %v3039_v51, %v1390_v63 }
 0x3f4   : > { %v3113_v43 = vpop.eup %2270  ;;  %2288 = vpow2.f32 %v1473_v55  ;;  %1512 = vadd.xlane.f32.xlu0 %v1511_v46 }
 0x3f5   : > { %v3115_v40 = vpop.eup %2272  ;;  %2290 = vpow2.f32 %v1467_v57  ;;  %v1475_v4 = vmul.f32 1.442695, %v1429_v42  ;;  %v1477_v7 = vmul.f32 1.442695, %v1430_v38 }
 0x3f6   : > { %2292 = vpow2.f32 %v1469_v60  ;;  %v1393_v10 = vpop.xlane.xlu0 %1392  ;;  %v1514_v47 = vadd.f32 %v3115_v40, %v3113_v43 }
 0x3f7   : > { %2294 = vpow2.f32 %v1475_v4  ;;  %v1431_v11 = vsub.f32 %v3043_v53, %v1393_v10  ;;  %v1432_v50 = vsub.f32 %v3045_v54, %v1393_v10 }
 0x3f8   : > { %v3121_v51 = vpop.eup %2274  ;;  %2296 = vpow2.f32 %v1477_v7  ;;  %1515 = vadd.xlane.f32.xlu1 %v1514_v47 }
 0x3f9   : > { %v3123_v48 = vpop.eup %2276  ;;  %v1479_v12 = vmul.f32 1.442695, %v1431_v11  ;;  %v1481_v13 = vmul.f32 1.442695, %v1432_v50 }
 0x3fa   : > { %v3125_v14 = vpop.eup %2278  ;;  %v1396_v15 = vpop.xlane.xlu1 %1395  ;;  %v1523_v25 = vadd.f32 %v3123_v48, %v3121_v51 }
 0x3fb   : > { %v3127_v16 = vpop.eup %2280  ;;  %2298 = vpow2.f32 %v1479_v12  ;;  %v1433_v17 = vsub.f32 %v3049_v45, %v1396_v15  ;;  %v1434_v53 = vsub.f32 %v3051_v56, %v1396_v15 }
 0x3fc   : > { %v3131_v18 = vpop.eup %2282  ;;  %2300 = vpow2.f32 %v1481_v13  ;;  %v1517_v54 = vadd.f32 %v3127_v16, %v3125_v14 }
 0x3fd   : > { %v3135_v19 = vpop.eup %2284  ;;  %v1483_v20 = vmul.f32 1.442695, %v1433_v17  ;;  %v1485_v21 = vmul.f32 1.442695, %v1434_v53 }
 0x3fe   : > { %1518 = vadd.xlane.f32.xlu0 %v1517_v54  ;;  %v1399_v22 = vpop.xlane.xlu0 %1398  ;;  %v1520_v23 = vadd.f32 %v3135_v19, %v3131_v18 }
 0x3ff   : > { %2302 = vpow2.f32 %v1483_v20  ;;  %v1435_v45 = vsub.f32 %v3055_v58, %v1399_v22  ;;  %v1436_v56 = vsub.f32 %v3057_v59, %v1399_v22 }
 0x400   : > { %v3141_v24 = vpop.eup %2286  ;;  %2304 = vpow2.f32 %v1485_v21  ;;  %1521 = vadd.xlane.f32.xlu1 %v1520_v23 }
 0x401   : > { %v3145_v26 = vpop.eup %2288  ;;  %v1487_v27 = vmul.f32 1.442695, %v1435_v45  ;;  %v1489_v28 = vmul.f32 1.442695, %v1436_v56 }
 0x402   : > { %v3147_v29 = vpop.eup %2290  ;;  %1524 = vadd.xlane.f32.xlu0 %v1523_v25  ;;  %v1402_v30 = vpop.xlane.xlu1 %1401  ;;  %v1529_v58 = vadd.f32 %v3145_v26, %v3141_v24 }
 0x403   : > { %v3151_v35 = vpop.eup %2292  ;;  %2306 = vpow2.f32 %v1487_v27  ;;  %v1437_v59 = vsub.f32 %v3061_v61, %v1402_v30  ;;  %v1438_v32 = vsub.f32 %v3063_v62, %v1402_v30 }
 0x404   : > { %v3155_v36 = vpop.eup %2294  ;;  %2308 = vpow2.f32 %v1489_v28  ;;  %v1526_v34 = vadd.f32 %v3151_v35, %v3147_v29 }
 0x405   : > { %v3159_v31 = vpop.eup %2296  ;;  %v1491_v33 = vmul.f32 1.442695, %v1437_v59  ;;  %v1493_v41 = vmul.f32 1.442695, %v1438_v32 }
 0x406   : > { %1530 = vadd.xlane.f32.xlu0 %v1529_v58  ;;  %1527 = vadd.xlane.f32.xlu1 %v1526_v34  ;;  %v1405_v44 = vpop.xlane.xlu0 %1404  ;;  %v1532_v37 = vadd.f32 %v3159_v31, %v3155_v36 }
 0x407   : > { %2310 = vpow2.f32 %v1491_v33  ;;  %v1439_v61 = vsub.f32 %v3067_v0, %v1405_v44  ;;  %v1440_v62 = vsub.f32 %v3069_v1, %v1405_v44 }
 0x408   : > { %v3165_v52 = vpop.eup %2298  ;;  %2312 = vpow2.f32 %v1493_v41 }
 0x409   : > { %v3167_v55 = vpop.eup %2300  ;;  %v1495_v57 = vmul.f32 1.442695, %v1439_v61  ;;  %v1497_v60 = vmul.f32 1.442695, %v1440_v62  ;;  %v1607_v61 = vld [vmem:[%s2839_s17] sm:$0xff]  ;;  %v1608_v62 = vld [vmem:[%s2839_s17 + $0x8] sm:$0xff] }
 0x40a   : > { %1533 = vadd.xlane.f32.xlu1 %v1532_v37  ;;  %v1408_v63 = vpop.xlane.xlu1 %1407  ;;  %v1535_v46 = vadd.f32 %v3167_v55, %v3165_v52 }
 0x40b   : > { %2314 = vpow2.f32 %v1495_v57  ;;  %v1441_v42 = vsub.f32 %v3073_v2, %v1408_v63  ;;  %v1442_v38 = vsub.f32 %v3075_v3, %v1408_v63 }
 0x40c   : > { %v3173_v0 = vpop.eup %2302  ;;  %2316 = vpow2.f32 %v1497_v60  ;;  %1536 = vadd.xlane.f32.xlu0 %v1535_v46 }
 0x40d   : > { %v3175_v1 = vpop.eup %2304  ;;  %v1499_v4 = vmul.f32 1.442695, %v1441_v42  ;;  %v1501_v7 = vmul.f32 1.442695, %v1442_v38 }
 0x40e   : > { %v1411_v10 = vpop.xlane.xlu0 %1410  ;;  %v1538_v47 = vadd.f32 %v3175_v1, %v3173_v0 }
 0x40f   : > { %2318 = vpow2.f32 %v1499_v4  ;;  %v1443_v11 = vsub.f32 %v3079_v5, %v1411_v10  ;;  %v1444_v50 = vsub.f32 %v3081_v6, %v1411_v10  ;;  %v1609_v4 = vld [vmem:[%s2839_s17 + $0x10] sm:$0xff] }
 0x410   : > { %v3181_v2 = vpop.eup %2306  ;;  %2320 = vpow2.f32 %v1501_v7  ;;  %1539 = vadd.xlane.f32.xlu1 %v1538_v47  ;;  %v1610_v7 = vld [vmem:[%s2839_s17 + $0x18] sm:$0xff] }
 0x411   : > { %v3183_v3 = vpop.eup %2308  ;;  %v1503_v12 = vmul.f32 1.442695, %v1443_v11  ;;  %v1505_v13 = vmul.f32 1.442695, %v1444_v50 }
 0x412   : > { %v1414_v15 = vpop.xlane.xlu1 %1413  ;;  %v1541_v17 = vadd.f32 %v3183_v3, %v3181_v2 }
 0x413   : > { %2322 = vpow2.f32 %v1503_v12  ;;  %v1445_v53 = vsub.f32 %v3085_v8, %v1414_v15  ;;  %v1446_v54 = vsub.f32 %v3087_v9, %v1414_v15  ;;  %v1611_v15 = vld [vmem:[%s2839_s17 + $0x20] sm:$0xff] }
 0x414   : > { %v3189_v5 = vpop.eup %2310  ;;  %2324 = vpow2.f32 %v1505_v13  ;;  %1542 = vadd.xlane.f32.xlu0 %v1541_v17  ;;  %v1612_v17 = vld [vmem:[%s2839_s17 + $0x28] sm:$0xff] }
 0x415   : > { %v3191_v6 = vpop.eup %2312  ;;  %v1507_v20 = vmul.f32 1.442695, %v1445_v53  ;;  %v1509_v21 = vmul.f32 1.442695, %v1446_v54 }
 0x416   : > { %v1544_v22 = vadd.f32 %v3191_v6, %v3189_v5 }
 0x417   : > { %2326 = vpow2.f32 %v1507_v20  ;;  %v1613_v20 = vld [vmem:[%s2839_s17 + $0x30] sm:$0xff] }
 0x418   : > { %v3195_v23 = vpop.eup %2314  ;;  %2328 = vpow2.f32 %v1509_v21  ;;  %1545 = vadd.xlane.f32.xlu1 %v1544_v22  ;;  %v1614_v21 = vld [vmem:[%s2839_s17 + $0x38] sm:$0xff] }
 0x419   : > { %v3197_v45 = vpop.eup %2316 }
 0x41a   : > { %v1547_v8 = vadd.f32 %v3197_v45, %v3195_v23 }
 0x41c   : > { %v3201_v9 = vpop.eup %2318  ;;  %1548 = vadd.xlane.f32.xlu0 %v1547_v8 }
 0x41d   : > { %v3203_v56 = vpop.eup %2320 }
 0x41e   : > { %v1550_v25 = vadd.f32 %v3203_v56, %v3201_v9 }
 0x420   : > { %v3207_v27 = vpop.eup %2322  ;;  %1551 = vadd.xlane.f32.xlu1 %v1550_v25 }
 0x421   : > { %v3209_v28 = vpop.eup %2324 }
 0x422   : > { %v1553_v30 = vadd.f32 %v3209_v28, %v3207_v27 }
 0x424   : > { %v3213_v58 = vpop.eup %2326  ;;  %1554 = vadd.xlane.f32.xlu0 %v1553_v30 }
 0x425   : > { %v3215_v59 = vpop.eup %2328 }
 0x426   : > { %v1556_v32 = vadd.f32 %v3215_v59, %v3213_v58 }
 0x428   : > { %1557 = vadd.xlane.f32.xlu1 %v1556_v32 }
 0x47d   : > { %v1513_v34 = vpop.xlane.xlu0 %1512 }
 0x47e   : > { %2330 = vrcp.f32 %v1513_v34  ;;  %v1615_v34 = vld [vmem:[%s2839_s17 + $0x40] sm:$0xff] }
 0x481   : > { %v1516_v33 = vpop.xlane.xlu1 %1515 }
 0x482   : > { %2332 = vrcp.f32 %v1516_v33  ;;  %v1616_v33 = vld [vmem:[%s2839_s17 + $0x48] sm:$0xff] }
 0x487   : > { %v1519_v41 = vpop.xlane.xlu0 %1518 }
 0x488   : > { %2334 = vrcp.f32 %v1519_v41 }
 0x489   : > { %v1522_v44 = vpop.xlane.xlu1 %1521 }
 0x48a   : > { %2336 = vrcp.f32 %v1522_v44 }
 0x48b   : > { %v2331_v37 = vpop.eup %2330  ;;  %v1525_v57 = vpop.xlane.xlu0 %1524 }
 0x48c   : > { %v1575_v60 = vmul.f32 %v2331_v37, %v3104_v49  ;;  %v1576_v63 = vmul.f32 %v2331_v37, %v3107_v39  ;;  %2338 = vrcp.f32 %v1525_v57  ;;  %v1620_v57 = vld [vmem:[%s2839_s17 + $0x68] sm:$0xff] }
 0x48e   : > { %v1639_v46 = vmul.f32 %v1607_v61, %v1575_v60  ;;  %v1640_v42 = vmul.f32 %v1608_v62, %v1576_v63  ;;  %v1619_v62 = vld [vmem:[%s2839_s17 + $0x60] sm:$0xff] }
 0x48f   : > { %v2333_v38 = vpop.eup %2332  ;;  %v1531_v10 = vpop.xlane.xlu0 %1530 }
 0x490   : > { %v1528_v47 = vpop.xlane.xlu1 %1527  ;;  %1671 = vst [vmem:[%s2845_s12] sm:$0xff] %v1639_v46  ;;  %1672 = vst [vmem:[%s2845_s12 + $0x8] sm:$0xff] %v1640_v42  ;;  %v1577_v11 = vmul.f32 %v2333_v38, %v3113_v43  ;;  %v1578_v49 = vmul.f32 %v2333_v38, %v3115_v40  ;;  %2340 = vrcp.f32 %v1531_v10  ;;  %v1617_v46 = vld [vmem:[%s2839_s17 + $0x50] sm:$0xff]  ;;  %v1618_v42 = vld [vmem:[%s2839_s17 + $0x58] sm:$0xff] }
 0x491   : > { %2342 = vrcp.f32 %v1528_v47 }
 0x492   : > { %v1641_v39 = vmul.f32 %v1609_v4, %v1577_v11  ;;  %v1642_v50 = vmul.f32 %v1610_v7, %v1578_v49 }
 0x494   : > { %v1534_v12 = vpop.xlane.xlu1 %1533  ;;  %1673 = vst [vmem:[%s2845_s12 + $0x10] sm:$0xff] %v1641_v39  ;;  %1674 = vst [vmem:[%s2845_s12 + $0x18] sm:$0xff] %v1642_v50  ;;  %v1622_v39 = vld [vmem:[%s2839_s17 + $0x78] sm:$0xff] }
 0x495   : > { %2344 = vrcp.f32 %v1534_v12  ;;  %v2335_v13 = vpop.eup %2334  ;;  %v1537_v53 = vpop.xlane.xlu0 %1536  ;;  %v1623_v12 = vld [vmem:[%s2839_s17 + $0x80] sm:$0xff] }
 0x496   : > { %v1579_v43 = vmul.f32 %v2335_v13, %v3125_v14  ;;  %v1580_v40 = vmul.f32 %v2335_v13, %v3127_v16  ;;  %2346 = vrcp.f32 %v1537_v53  ;;  %v1624_v13 = vld [vmem:[%s2839_s17 + $0x88] sm:$0xff] }
 0x497   : > { %v2337_v54 = vpop.eup %2336 }
 0x498   : > { %v1643_v22 = vmul.f32 %v1611_v15, %v1579_v43  ;;  %v1644_v8 = vmul.f32 %v1612_v17, %v1580_v40  ;;  %v1581_v25 = vmul.f32 %v2337_v54, %v3131_v18  ;;  %v1582_v30 = vmul.f32 %v2337_v54, %v3135_v19 }
 0x499   : > { %v2339_v32 = vpop.eup %2338  ;;  %v1540_v14 = vpop.xlane.xlu1 %1539 }
 0x49a   : > { %1675 = vst [vmem:[%s2845_s12 + $0x20] sm:$0xff] %v1643_v22  ;;  %1676 = vst [vmem:[%s2845_s12 + $0x28] sm:$0xff] %v1644_v8  ;;  %v1583_v16 = vmul.f32 %v2339_v32, %v3121_v51  ;;  %v1584_v41 = vmul.f32 %v2339_v32, %v3123_v48  ;;  %v1645_v44 = vmul.f32 %v1613_v20, %v1581_v25  ;;  %2348 = vrcp.f32 %v1540_v14  ;;  %v1625_v20 = vld [vmem:[%s2839_s17 + $0x90] sm:$0xff]  ;;  %v1627_v32 = vld [vmem:[%s2839_s17 + $0xa0] sm:$0xff] }
 0x49b   : > { %v1646_v18 = vmul.f32 %v1614_v21, %v1582_v30  ;;  %v1626_v21 = vld [vmem:[%s2839_s17 + $0x98] sm:$0xff] }
 0x49c   : > { %v1647_v19 = vmul.f32 %v1615_v34, %v1583_v16  ;;  %v1648_v37 = vmul.f32 %v1616_v33, %v1584_v41  ;;  %1677 = vst [vmem:[%s2845_s12 + $0x30] sm:$0xff] %v1645_v44  ;;  %v1628_v34 = vld [vmem:[%s2839_s17 + $0xa8] sm:$0xff]  ;;  %v1629_v44 = vld [vmem:[%s2839_s17 + $0xb0] sm:$0xff] }
 0x49d   : > { %1678 = vst [vmem:[%s2845_s12 + $0x38] sm:$0xff] %v1646_v18  ;;  %v2341_v61 = vpop.eup %2340  ;;  %v1543_v60 = vpop.xlane.xlu0 %1542  ;;  %v1630_v18 = vld [vmem:[%s2839_s17 + $0xb8] sm:$0xff] }
 0x49e   : > { %v2343_v63 = vpop.eup %2342  ;;  %1679 = vst [vmem:[%s2845_s12 + $0x40] sm:$0xff] %v1647_v19  ;;  %1680 = vst [vmem:[%s2845_s12 + $0x48] sm:$0xff] %v1648_v37  ;;  %v1587_v51 = vmul.f32 %v2341_v61, %v3141_v24  ;;  %v1588_v48 = vmul.f32 %v2341_v61, %v3145_v26  ;;  %2350 = vrcp.f32 %v1543_v60  ;;  %v1621_v24 = vld [vmem:[%s2839_s17 + $0x70] sm:$0xff]  ;;  %v1632_v60 = vld [vmem:[%s2839_s17 + $0xc8] sm:$0xff] }
 0x49f   : > { %v1585_v38 = vmul.f32 %v2343_v63, %v3147_v29  ;;  %v1586_v4 = vmul.f32 %v2343_v63, %v3151_v35 }
 0x4a0   : > { %v1651_v7 = vmul.f32 %v1619_v62, %v1587_v51  ;;  %v1652_v10 = vmul.f32 %v1620_v57, %v1588_v48  ;;  %v1631_v57 = vld [vmem:[%s2839_s17 + $0xc0] sm:$0xff] }
 0x4a1   : > { %v1649_v11 = vmul.f32 %v1617_v46, %v1585_v38  ;;  %v1650_v49 = vmul.f32 %v1618_v42, %v1586_v4  ;;  %v1546_v50 = vpop.xlane.xlu1 %1545  ;;  %v1633_v46 = vld [vmem:[%s2839_s17 + $0xd0] sm:$0xff]  ;;  %v1634_v42 = vld [vmem:[%s2839_s17 + $0xd8] sm:$0xff] }
 0x4a2   : > { %v2345_v47 = vpop.eup %2344  ;;  %1683 = vst [vmem:[%s2845_s12 + $0x60] sm:$0xff] %v1651_v7  ;;  %1684 = vst [vmem:[%s2845_s12 + $0x68] sm:$0xff] %v1652_v10  ;;  %2352 = vrcp.f32 %v1546_v50  ;;  %v1635_v10 = vld [vmem:[%s2839_s17 + $0xe0] sm:$0xff]  ;;  %v1638_v50 = vld [vmem:[%s2839_s17 + $0xf8] sm:$0xff] }
 0x4a3   : > { %v1589_v26 = vmul.f32 %v2345_v47, %v3155_v36  ;;  %v1590_v29 = vmul.f32 %v2345_v47, %v3159_v31  ;;  %v2347_v35 = vpop.eup %2346  ;;  %1681 = vst [vmem:[%s2845_s12 + $0x50] sm:$0xff] %v1649_v11  ;;  %1682 = vst [vmem:[%s2845_s12 + $0x58] sm:$0xff] %v1650_v49  ;;  %v1636_v47 = vld [vmem:[%s2839_s17 + $0xe8] sm:$0xff] }
 0x4a4   : > { %v1591_v53 = vmul.f32 %v2347_v35, %v3165_v52  ;;  %v1592_v43 = vmul.f32 %v2347_v35, %v3167_v55 }
 0x4a5   : > { %v1653_v15 = vmul.f32 %v1621_v24, %v1589_v26  ;;  %v1654_v17 = vmul.f32 %v1622_v39, %v1590_v29  ;;  %v1549_v40 = vpop.xlane.xlu0 %1548  ;;  %v1637_v39 = vld [vmem:[%s2839_s17 + $0xf0] sm:$0xff]  ;;  %s1704_s17 = scalar_lea.sflag [#allocation5], %s2820_s0 }
 0x4a6   : > { %v1655_v36 = vmul.f32 %v1623_v12, %v1591_v53  ;;  %v1656_v31 = vmul.f32 %v1624_v13, %v1592_v43  ;;  %2354 = vrcp.f32 %v1549_v40 }
 0x4a7   : > { %1685 = vst [vmem:[%s2845_s12 + $0x70] sm:$0xff] %v1653_v15  ;;  %1686 = vst [vmem:[%s2845_s12 + $0x78] sm:$0xff] %v1654_v17  ;;  %v2349_v54 = vpop.eup %2348 }
 0x4a8   : > { %1687 = vst [vmem:[%s2845_s12 + $0x80] sm:$0xff] %v1655_v36  ;;  %1688 = vst [vmem:[%s2845_s12 + $0x88] sm:$0xff] %v1656_v31  ;;  %v1593_v22 = vmul.f32 %v2349_v54, %v3173_v0  ;;  %v1594_v52 = vmul.f32 %v2349_v54, %v3175_v1 }
 0x4a9   : > { %v1552_v55 = vpop.xlane.xlu1 %1551 }
 0x4aa   : > { %2356 = vrcp.f32 %v1552_v55  ;;  %v1657_v25 = vmul.f32 %v1625_v20, %v1593_v22  ;;  %v1658_v30 = vmul.f32 %v1626_v21, %v1594_v52 }
 0x4ab   : > { %v2351_v8 = vpop.eup %2350 }
 0x4ac   : > { %v1595_v33 = vmul.f32 %v2351_v8, %v3181_v2  ;;  %v1596_v14 = vmul.f32 %v2351_v8, %v3183_v3  ;;  %1689 = vst [vmem:[%s2845_s12 + $0x90] sm:$0xff] %v1657_v25  ;;  %1690 = vst [vmem:[%s2845_s12 + $0x98] sm:$0xff] %v1658_v30 }
 0x4ad   : > { %v1555_v0 = vpop.xlane.xlu0 %1554 }
 0x4ae   : > { %v1659_v1 = vmul.f32 %v1627_v32, %v1595_v33  ;;  %v1660_v16 = vmul.f32 %v1628_v34, %v1596_v14  ;;  %2358 = vrcp.f32 %v1555_v0 }
 0x4af   : > { %v2353_v41 = vpop.eup %2352 }
 0x4b0   : > { %1691 = vst [vmem:[%s2845_s12 + $0xa0] sm:$0xff] %v1659_v1  ;;  %1692 = vst [vmem:[%s2845_s12 + $0xa8] sm:$0xff] %v1660_v16  ;;  %v1597_v19 = vmul.f32 %v2353_v41, %v3189_v5  ;;  %v1598_v2 = vmul.f32 %v2353_v41, %v3191_v6 }
 0x4b1   : > { %v1558_v3 = vpop.xlane.xlu1 %1557 }
 0x4b2   : > { %v1661_v37 = vmul.f32 %v1629_v44, %v1597_v19  ;;  %v1662_v61 = vmul.f32 %v1630_v18, %v1598_v2  ;;  %2360 = vrcp.f32 %v1558_v3 }
 0x4b3   : > { %v2355_v62 = vpop.eup %2354 }
 0x4b4   : > { %1693 = vst [vmem:[%s2845_s12 + $0xb0] sm:$0xff] %v1661_v37  ;;  %1694 = vst [vmem:[%s2845_s12 + $0xb8] sm:$0xff] %v1662_v61  ;;  %v1599_v63 = vmul.f32 %v2355_v62, %v3195_v23  ;;  %v1600_v5 = vmul.f32 %v2355_v62, %v3197_v45 }
 0x4b6   : > { %v1663_v6 = vmul.f32 %v1631_v57, %v1599_v63  ;;  %v1664_v51 = vmul.f32 %v1632_v60, %v1600_v5 }
 0x4b7   : > { %v2357_v48 = vpop.eup %2356 }
 0x4b8   : > { %1695 = vst [vmem:[%s2845_s12 + $0xc0] sm:$0xff] %v1663_v6  ;;  %1696 = vst [vmem:[%s2845_s12 + $0xc8] sm:$0xff] %v1664_v51  ;;  %v1601_v38 = vmul.f32 %v2357_v48, %v3201_v9  ;;  %v1602_v4 = vmul.f32 %v2357_v48, %v3203_v56 }
 0x4ba   : > { %v1665_v23 = vmul.f32 %v1633_v46, %v1601_v38  ;;  %v1666_v45 = vmul.f32 %v1634_v42, %v1602_v4 }
 0x4bb   : > { %v2359_v7 = vpop.eup %2358 }
 0x4bc   : > { %1697 = vst [vmem:[%s2845_s12 + $0xd0] sm:$0xff] %v1665_v23  ;;  %1698 = vst [vmem:[%s2845_s12 + $0xd8] sm:$0xff] %v1666_v45  ;;  %v1603_v11 = vmul.f32 %v2359_v7, %v3207_v27  ;;  %v1604_v9 = vmul.f32 %v2359_v7, %v3209_v28 }
 0x4be   : > { %v1667_v56 = vmul.f32 %v1635_v10, %v1603_v11  ;;  %v1668_v49 = vmul.f32 %v1636_v47, %v1604_v9 }
 0x4bf   : > { %v2361_v24 = vpop.eup %2360 }
 0x4c0   : > { %1699 = vst [vmem:[%s2845_s12 + $0xe0] sm:$0xff] %v1667_v56  ;;  %1700 = vst [vmem:[%s2845_s12 + $0xe8] sm:$0xff] %v1668_v49  ;;  %v1605_v26 = vmul.f32 %v2361_v24, %v3213_v58  ;;  %v1606_v27 = vmul.f32 %v2361_v24, %v3215_v59 }
 0x4c2   : > { %v1669_v28 = vmul.f32 %v1637_v39, %v1605_v26  ;;  %v1670_v29 = vmul.f32 %v1638_v50, %v1606_v27 }
 0x4c4   : > { %1701 = vst [vmem:[%s2845_s12 + $0xf0] sm:$0xff] %v1669_v28  ;;  %1702 = vst [vmem:[%s2845_s12 + $0xf8] sm:$0xff] %v1670_v29 }
 0x4c5   : > { %2459 = shalt.err (!%p2456_p13)
}
 0x4c6   : > { %s2460_s12 = scalar_lea.hbm %s3321_s6, 4096  ;;  %s2464_s13 = scalar_lea.hbm %s3445_s20, 16384 }
 0x4c7   : > { %p2461_p7 = scmp.ne.s32.totalorder %s3321_s6, %s2460_s12  ;;  %p2465_p1 = scmp.lt.s32.totalorder %s3321_s6, %s3445_s20 }
 0x4c8   : > { %p2466_p4 = scmp.lt.s32.totalorder %s2464_s13, %s2460_s12 }
 0x4c9   : > { %p2462_p5 = pnand %p2461_p7, %p2759_p3 }
 0x4ca   : > { %p2467_p6 = por %p2466_p4, %p2465_p1 }
 0x4cb   : > { %p2463_p10 = pneg %p2462_p5 }
 0x4cd   : > { %p2468_p2 = pnand %p2467_p6, %p2463_p10 }
 0x4cf   : > { %2471 = shalt.err (!%p2468_p2)
}
 0x4d0   : > { %s2586_s18 = smov 256   ;;  %s2587_s14 = smov 16  }
 0x4d1   : > { %2095 = dma.vmem_to_hbm [thread:$0]  (%p2759_p3), %s3316_s30, 4096, %s3321_s6, %s1704_s17, %s2586_s18, %s2586_s18, %s2587_s14  }
 0x4d2 PF: > { %s3446_s24 = sld [smem:[#allocation15_spill]]  ;;  %p2112_p11 = scmp.ge.s32.totalorder %s2574_s11, 2 }
 0x4d4   : > { %p2108_p8 = pnand %p2112_p11, %p2765_p0 }
 0x4d6   : > { %p2109_p9 = pneg %p2108_p8 }
 0x4d8   : > { %s1735_s4 = sand.u32 1, %s3446_s24  }
 0x4d9   : > { %s1736_s3 = scalar_lea.sflag [#allocation5], %s1735_s4 }
 0x4da   : > { %2529 = dma.done.wait (%p2109_p9), %s1736_s3, 4096  }
 0x4db   : > { %2531 = vsyncadd (%p2109_p9), %s1736_s3, 4294963200  ;;  %s26_s11 = sadd.s32 1, %s2574_s11   ;;  %s3448_s1 = sld [smem:[#allocation14_spill]] }
 0x4dc   : > { %p23_p12 = scmp.ge.s32.totalorder %s26_s11, 6   ;;  %s3449_s26 = sld [smem:[#allocation22_spill]] }
 0x4dd   : > { %s3450_s0 = sld [smem:[#allocation16_spill]]  ;;  %s3454_s24 = smov %s2538_s25 }
 0x4de   : > { %s3451_s29 = sld [smem:[#allocation23_spill]]  ;;  %s3456_s27 = smov %s2550_s28 }
 0x4df   : > { %s3452_s21 = sld [smem:[#allocation18_spill]]  ;;  %s3458_s30 = smov %s2566_s9 }
 0x4e0   : > { %s3453_s6 = sld [smem:[#allocation19_spill]]  ;;  %s3459_s8 = smov %s2570_s10 }
 0x4e1   : > { %s3455_s25 = smov %s3448_s1 }
 0x4e2   :  { %25 = sbr.rel (!%p23_p12) target bundleno = 19 (0x13), region = 121 }
 0x4e3   : > { %s3457_s28 = smov %s3450_s0 }
 0x4e5   : > { %s3460_s9 = smov %s3452_s21 }
 0x4e6   : > { %s3461_s10 = smov %s3453_s6 }
 0x4e7   :  { %1741 = vsyncpa [#allocation4], 1 }
 0x4e8   :  { %1743 = vsyncpa [#allocation4 + $0x1], 1 }
 0x4e9   :  { %1744 = vsyncpa [#allocation7], 1 }
 0x4ea   :  { %1746 = vsyncpa [#allocation7 + $0x1], 1 }
 0x4eb   :  { %1747 = vsyncpa [#allocation5], 1 }
 0x4ec   :  { %1749 = vsyncpa [#allocation5 + $0x1], 1 }

</bundles_post_ra>
